<compile_context>
chip_gen: v5e
topology: v5e:2x2
jax: 0.10.0
libtpu: 0.0.40
codegen_flags: <defaults>
</compile_context>

<pallas_src>
import functools

import jax
import jax.numpy as jnp
from jax.experimental import pallas as pl
from jax.experimental.pallas import tpu as pltpu


def _round_up(n: int, m: int) -> int:
    return ((n + m - 1) // m) * m


def _cdiv(a: int, b: int) -> int:
    return (a + b - 1) // b


# ----------------------------------------------------------------------------
# Pallas kernel: full MDN forward for one batch tile.
#
# x_ref:   (pack, TBh, D)  — `pack` independent batch halves, TBh rows each.
# out_ref: (TBh, slab_cols) packed slab; half h occupies lanes
#          [h*lane_stride, h*lane_stride + 3G + D + H2).  Remaining lanes are
#          left untouched (stale) — the unpacker never reads them.
# ----------------------------------------------------------------------------
def mdn_kernel(
    x_ref,
    wa1_ref, ba1_ref,          # attention Linear(input_dim, hidden//4)
    wa2_ref, ba2_ref,          # attention Linear(hidden//4, input_dim)
    w1_ref, b1_ref,            # feature_net Linear1 (BN1 folded in)
    w2_ref, b2_ref,            # feature_net Linear2 (BN2 folded in)
    w3_ref, b3_ref,            # feature_net Linear3 (BN3 folded in)
    wh_ref, bh_ref,            # fused heads: [H2, 3G], [1, 3G] (pi | mu | sigma)
    out_ref,
    *, n_gaussians, input_dim, feat_dim, pack, lane_stride,
):
    G, D, H2 = n_gaussians, input_dim, feat_dim

    for h in range(pack):                     # static unroll, pack in {1, 2}
        x = x_ref[h]                          # (TBh, D)

        # ---- attention branch: Linear -> tanh -> Linear -> softmax(dim=1) ----
        h_att = jnp.tanh(
            jnp.dot(x, wa1_ref[...], preferred_element_type=jnp.float32)
            + ba1_ref[...]
        )
        att_logits = (
            jnp.dot(h_att, wa2_ref[...], preferred_element_type=jnp.float32)
            + ba2_ref[...]
        )
        att_logits = att_logits - jnp.max(att_logits, axis=1, keepdims=True)
        att_exp = jnp.exp(att_logits)
        # exact division (kernel is HBM-bound; VPU slack makes this free)
        att = att_exp / jnp.sum(att_exp, axis=1, keepdims=True)

        # ---- attended input ----
        xa = x * att

        # ---- feature_net (Dropout = identity in eval; BN folded into W/b) ----
        h1 = jnp.maximum(
            jnp.dot(xa, w1_ref[...], preferred_element_type=jnp.float32)
            + b1_ref[...], 0.0)
        h2 = jnp.maximum(
            jnp.dot(h1, w2_ref[...], preferred_element_type=jnp.float32)
            + b2_ref[...], 0.0)
        feat = jnp.maximum(
            jnp.dot(h2, w3_ref[...], preferred_element_type=jnp.float32)
            + b3_ref[...], 0.0)

        # ---- fused mixture heads: one MXU matmul for pi|mu|sigma ----
        heads = (
            jnp.dot(feat, wh_ref[...], preferred_element_type=jnp.float32)
            + bh_ref[...]
        )
        pi_logits = heads[:, 0:G]
        mu = heads[:, G:2 * G]
        sig_raw = heads[:, 2 * G:3 * G]

        pi_logits = pi_logits - jnp.max(pi_logits, axis=1, keepdims=True)
        pi_exp = jnp.exp(pi_logits)
        pi = pi_exp / jnp.sum(pi_exp, axis=1, keepdims=True)

        # softplus with PyTorch's threshold=20 behaviour
        softplus = jnp.where(sig_raw > 20.0, sig_raw, jnp.log1p(jnp.exp(sig_raw)))
        sigma = softplus + 0.1

        # ---- epilogue: write only the valid columns (no concat / zero fill) ----
        base = h * lane_stride
        out_ref[:, base + 0:base + G] = pi
        out_ref[:, base + G:base + 2 * G] = mu
        out_ref[:, base + 2 * G:base + 3 * G] = sigma
        out_ref[:, base + 3 * G:base + 3 * G + D] = att
        out_ref[:, base + 3 * G + D:base + 3 * G + D + H2] = feat


# ----------------------------------------------------------------------------
# Parameter construction (deterministic stand-in for the PyTorch init).
# ----------------------------------------------------------------------------
def _linear_init(key, fan_in, fan_out, dtype=jnp.float32):
    """PyTorch-default Linear init (uniform +-1/sqrt(fan_in)), weight pre-transposed."""
    kw, kb = jax.random.split(key)
    bound = 1.0 / jnp.sqrt(jnp.asarray(fan_in, dtype))
    w = jax.random.uniform(kw, (fan_in, fan_out), dtype, -bound, bound)  # [in, out]
    b = jax.random.uniform(kb, (1, fan_out), dtype, -bound, bound)
    return w, b


def _fold_bn(w, b, gamma, beta, mean, var, eps=1e-5):
    """Fold eval-mode BatchNorm1d into the preceding Linear: y = x@W' + b'."""
    s = gamma / jnp.sqrt(var + eps)              # [out]
    w_f = w * s[None, :]
    b_f = b * s[None, :] + (beta - mean * s)[None, :]
    return w_f, b_f


def make_params(key, input_dim, hidden_dim, n_gaussians):
    h4 = hidden_dim // 4
    h2 = hidden_dim // 2
    keys = jax.random.split(key, 8)

    # attention
    wa1, ba1 = _linear_init(keys[0], input_dim, h4)
    wa2, ba2 = _linear_init(keys[1], h4, input_dim)

    # feature_net linears
    w1, b1 = _linear_init(keys[2], input_dim, hidden_dim)
    w2, b2 = _linear_init(keys[3], hidden_dim, hidden_dim)
    w3, b3 = _linear_init(keys[4], hidden_dim, h2)

    # BatchNorm params (defaults: gamma=1, beta=0, running_mean=0, running_var=1)
    def bn_default(n):
        return (jnp.ones((n,)), jnp.zeros((n,)), jnp.zeros((n,)), jnp.ones((n,)))

    w1, b1 = _fold_bn(w1, b1, *bn_default(hidden_dim))
    w2, b2 = _fold_bn(w2, b2, *bn_default(hidden_dim))
    w3, b3 = _fold_bn(w3, b3, *bn_default(h2))

    # mixture heads (matching _initialize_mixture_heads)
    wpi = jnp.zeros((h2, n_gaussians), jnp.float32)
    bpi = jnp.zeros((1, n_gaussians), jnp.float32)
    wmu = 0.1 * jax.random.normal(keys[5], (h2, n_gaussians), jnp.float32)
    bmu = jnp.linspace(0.5, 4.0, n_gaussians, dtype=jnp.float32)[None, :]
    wsig = jnp.zeros((h2, n_gaussians), jnp.float32)
    bsig = jnp.full((1, n_gaussians), 0.5, jnp.float32)

    return dict(
        wa1=wa1, ba1=ba1, wa2=wa2, ba2=ba2,
        w1=w1, b1=b1, w2=w2, b2=b2, w3=w3, b3=b3,
        wpi=wpi, bpi=bpi, wmu=wmu, bmu=bmu, wsig=wsig, bsig=bsig,
    )


def _packing(out_cols):
    """2 logical batch rows per 128-lane slab row when they fit, else 1."""
    if out_cols <= 64:
        return 2, 64, 128
    return 1, _round_up(out_cols, 128), _round_up(out_cols, 128)


# ----------------------------------------------------------------------------
# Primary API: batch-tiled pallas_call returning ONLY the packed slab
# (no wrapper-side slicing -> no second HBM pass).
# ----------------------------------------------------------------------------
@functools.partial(jax.jit, static_argnames=("n_gaussians", "batch_tile"))
def mdn_forward_packed(x, params, n_gaussians, batch_tile=2048):
    """Returns the packed (rows_pad, slab_cols) f32 slab.

    Slab layout: for half h in range(pack), lanes [h*lane_stride, ...) hold
    [pi | mu | sigma | attention | features] for logical rows
    [h*rows_pad, h*rows_pad + rows_pad).  Pad lanes / pad rows are garbage.
    Use `unpack_mdn_outputs` (fusable into the consumer's jit) to slice.

    batch_tile = logical batch rows per grid step.  Default 2048 is safe on
    v5e/v6e/v7x with the 48 MiB vmem limit below; raise to 4096-8192 on v7x
    (3.2 TB/s HBM) to better amortize the ~0.35 us per-step overhead.
    """
    B, D = x.shape
    H2 = params["w3"].shape[1]
    G = n_gaussians

    out_cols = 3 * G + D + H2
    pack, lane_stride, slab_cols = _packing(out_cols)

    # --- tile / grid selection ---------------------------------------------
    # rows below are PACKED slab rows (each carries `pack` logical batch rows).
    Bp = _round_up(B, 8 * pack)                    # logical rows, sublane aligned
    rows = Bp // pack
    rows_per_step_target = max(8, batch_tile // pack)
    n_min = 2 if rows >= 16 else 1                 # >=2 grid steps when possible so
    #                                                "parallel" can use both v7x TCs
    n_steps = max(n_min, _cdiv(rows, rows_per_step_target))
    TBh = _round_up(_cdiv(rows, n_steps), 8)       # packed rows per grid step
    rows_pad = TBh * n_steps
    B_pad = rows_pad * pack

    # Padded batch rows (zeros) flow through the softmaxes (-> uniform rows);
    # their results land past the valid region and are sliced off by unpack.
    xp = jnp.pad(x, ((0, B_pad - B), (0, 0))) if B_pad != B else x
    x3 = xp.reshape(pack, rows_pad, D)             # leading-dim reshape: no relayout

    # Fuse the three head matmuls into one [H2, 3G] matmul.
    wh = jnp.concatenate([params["wpi"], params["wmu"], params["wsig"]], axis=1)
    bh = jnp.concatenate([params["bpi"], params["bmu"], params["bsig"]], axis=1)

    weights = (
        params["wa1"], params["ba1"], params["wa2"], params["ba2"],
        params["w1"], params["b1"], params["w2"], params["b2"],
        params["w3"], params["b3"],
        wh, bh,
    )

    def const_spec(arr):
        # Weights/biases: whole-array block, same block for every grid step
        # => stay VMEM-resident across the batch loop.
        return pl.BlockSpec(arr.shape, lambda i: (0, 0))

    kernel = functools.partial(
        mdn_kernel, n_gaussians=G, input_dim=D, feat_dim=H2,
        pack=pack, lane_stride=lane_stride,
    )

    slab = pl.pallas_call(
        kernel,
        out_shape=jax.ShapeDtypeStruct((rows_pad, slab_cols), jnp.float32),
        grid=(n_steps,),
        in_specs=[pl.BlockSpec((pack, TBh, D), lambda i: (0, i, 0))]
                 + [const_spec(w) for w in weights],
        out_specs=pl.BlockSpec((TBh, slab_cols), lambda i: (i, 0)),
        compiler_params=pltpu.CompilerParams(
            dimension_semantics=("parallel",),      # v7x: shard batch over both TCs
            vmem_limit_bytes=48 * 1024 * 1024,      # above v5e's 16 MiB default scope
        ),
    )(x3, *weights)

    return slab


def unpack_mdn_outputs(slab, batch, input_dim, feat_dim, n_gaussians):
    """Slice the logical outputs out of the packed slab.

    Plain jnp ops: fuse this into the downstream jit that consumes
    pi/mu/sigma to avoid an extra HBM pass over the slab.
    """
    G, D, H2 = n_gaussians, input_dim, feat_dim
    out_cols = 3 * G + D + H2
    pack, lane_stride, _ = _packing(out_cols)

    def grab(lo, hi):
        cols = [slab[:, h * lane_stride + lo:h * lane_stride + hi]
                for h in range(pack)]
        full = cols[0] if pack == 1 else jnp.concatenate(cols, axis=0)
        return full[:batch]

    return {
        "pi": grab(0, G),
        "mu": grab(G, 2 * G),
        "sigma": grab(2 * G, 3 * G),
        "attention_weights": grab(3 * G, 3 * G + D),
        "features": grab(3 * G + D, 3 * G + D + H2),
    }


def mdn_forward(x, params, n_gaussians, batch_tile=2048):
    """PyTorch-style dict API.

    NOTE: materializing the five sliced arrays costs one extra HBM pass over
    the slab; performance-critical consumers should call mdn_forward_packed()
    and fuse unpack_mdn_outputs() into their own jitted computation.
    """
    slab = mdn_forward_packed(x, params, n_gaussians, batch_tile=batch_tile)
    return unpack_mdn_outputs(
        slab, x.shape[0], x.shape[1], params["w3"].shape[1], n_gaussians
    )


# ----------------------------------------------------------------------------
# Pure-JAX reference (eval-mode semantics) for correctness checking.
# ----------------------------------------------------------------------------
def mdn_reference(x, params, n_gaussians):
    h_att = jnp.tanh(x @ params["wa1"] + params["ba1"])
    att = jax.nn.softmax(h_att @ params["wa2"] + params["ba2"], axis=1)
    xa = x * att
    h1 = jax.nn.relu(xa @ params["w1"] + params["b1"])
    h2 = jax.nn.relu(h1 @ params["w2"] + params["b2"])
    feat = jax.nn.relu(h2 @ params["w3"] + params["b3"])
    pi = jax.nn.softmax(feat @ params["wpi"] + params["bpi"], axis=1)
    mu = feat @ params["wmu"] + params["bmu"]
    sigma = jax.nn.softplus(feat @ params["wsig"] + params["bsig"]) + 0.1
    return {"pi": pi, "mu": mu, "sigma": sigma,
            "attention_weights": att, "features": feat}


if __name__ == "__main__":
    input_dim, hidden_dim, n_gaussians = 16, 32, 5
    batch = 64   # exercises the 2-rows-per-slab-row packing and a 2-step grid

    key = jax.random.PRNGKey(0)
    k_x, k_p = jax.random.split(key)
    x = jax.random.normal(k_x, (batch, input_dim), jnp.float32)
    params = make_params(k_p, input_dim, hidden_dim, n_gaussians)

    out = mdn_forward(x, params, n_gaussians)
    jax.block_until_ready(out)

    # shape checks
    assert out["pi"].shape == (batch, n_gaussians)
    assert out["mu"].shape == (batch, n_gaussians)
    assert out["sigma"].shape == (batch, n_gaussians)
    assert out["attention_weights"].shape == (batch, input_dim)
    assert out["features"].shape == (batch, hidden_dim // 2)

    # numerical checks against the pure-JAX reference (exact softmax division
    # lets these tolerances stay tight)
    ref = mdn_reference(x, params, n_gaussians)
    for name in ("pi", "mu", "sigma", "attention_weights", "features"):
        assert bool(jnp.allclose(out[name], ref[name], atol=1e-4, rtol=1e-4)), name

    assert bool(jnp.all(out["sigma"] > 0.1 - 1e-6))
    assert bool(jnp.allclose(jnp.sum(out["pi"], axis=1), 1.0, atol=1e-4))
    assert bool(jnp.allclose(jnp.sum(out["attention_weights"], axis=1), 1.0, atol=1e-4))

    print("KERNEL_OK")
</pallas_src>

<mosaic_0001>
module attributes {stable_mosaic.version = 11 : i64} {
  func.func @mdn_kernel(%arg0: i32, %arg1: memref<2x16x16xf32, #tpu.memory_space<vmem>>, %arg2: memref<16x8xf32, #tpu.memory_space<vmem>>, %arg3: memref<1x8xf32, #tpu.memory_space<vmem>>, %arg4: memref<8x16xf32, #tpu.memory_space<vmem>>, %arg5: memref<1x16xf32, #tpu.memory_space<vmem>>, %arg6: memref<16x32xf32, #tpu.memory_space<vmem>>, %arg7: memref<1x32xf32, #tpu.memory_space<vmem>>, %arg8: memref<32x32xf32, #tpu.memory_space<vmem>>, %arg9: memref<1x32xf32, #tpu.memory_space<vmem>>, %arg10: memref<32x16xf32, #tpu.memory_space<vmem>>, %arg11: memref<1x16xf32, #tpu.memory_space<vmem>>, %arg12: memref<16x15xf32, #tpu.memory_space<vmem>>, %arg13: memref<1x15xf32, #tpu.memory_space<vmem>>, %arg14: memref<16x128xf32, #tpu.memory_space<vmem>>) attributes {dimension_semantics = [#tpu.dimension_semantics<parallel>], iteration_bounds = array<i64: 2>, scalar_prefetch = 0 : i64, scratch_operands = 0 : i64, tpu.core_type = #tpu.core_type<tc>, window_params = [{transform_indices = @transform_0, window_bounds = array<i64: 2, 16, 16>}, {pipeline_mode = #tpu.pipeline_mode<synchronous>, transform_indices = @transform_1, window_bounds = array<i64: 16, 8>}, {pipeline_mode = #tpu.pipeline_mode<synchronous>, transform_indices = @transform_2, window_bounds = array<i64: 1, 8>}, {pipeline_mode = #tpu.pipeline_mode<synchronous>, transform_indices = @transform_3, window_bounds = array<i64: 8, 16>}, {pipeline_mode = #tpu.pipeline_mode<synchronous>, transform_indices = @transform_4, window_bounds = array<i64: 1, 16>}, {pipeline_mode = #tpu.pipeline_mode<synchronous>, transform_indices = @transform_5, window_bounds = array<i64: 16, 32>}, {pipeline_mode = #tpu.pipeline_mode<synchronous>, transform_indices = @transform_6, window_bounds = array<i64: 1, 32>}, {pipeline_mode = #tpu.pipeline_mode<synchronous>, transform_indices = @transform_7, window_bounds = array<i64: 32, 32>}, {pipeline_mode = #tpu.pipeline_mode<synchronous>, transform_indices = @transform_8, window_bounds = array<i64: 1, 32>}, {pipeline_mode = #tpu.pipeline_mode<synchronous>, transform_indices = @transform_9, window_bounds = array<i64: 32, 16>}, {pipeline_mode = #tpu.pipeline_mode<synchronous>, transform_indices = @transform_10, window_bounds = array<i64: 1, 16>}, {pipeline_mode = #tpu.pipeline_mode<synchronous>, transform_indices = @transform_11, window_bounds = array<i64: 16, 15>}, {pipeline_mode = #tpu.pipeline_mode<synchronous>, transform_indices = @transform_12, window_bounds = array<i64: 1, 15>}, {transform_indices = @transform_13, window_bounds = array<i64: 16, 128>}]} {
    %c0 = arith.constant 0 : index
    %c0_0 = arith.constant 0 : index
    %c0_1 = arith.constant 0 : index
    %0 = vector.load %arg1[%c0, %c0_0, %c0_1] : memref<2x16x16xf32, #tpu.memory_space<vmem>>, vector<1x16x16xf32>
    %1 = vector.shape_cast %0 : vector<1x16x16xf32> to vector<16x16xf32>
    %c0_2 = arith.constant 0 : index
    %c0_3 = arith.constant 0 : index
    %2 = vector.load %arg2[%c0_2, %c0_3] : memref<16x8xf32, #tpu.memory_space<vmem>>, vector<16x8xf32>
    %cst = arith.constant dense<0.000000e+00> : vector<16x8xf32>
    %3 = tpu.matmul %1, %2, %cst {dimension_numbers = #tpu.dot_dimension_numbers<[1], [0], [0], [1], [0, 0, 1, 1], [], []>} : vector<16x16xf32>, vector<16x8xf32>, vector<16x8xf32> -> vector<16x8xf32>
    %c0_4 = arith.constant 0 : index
    %c0_5 = arith.constant 0 : index
    %4 = vector.load %arg3[%c0_4, %c0_5] : memref<1x8xf32, #tpu.memory_space<vmem>>, vector<1x8xf32>
    %5 = vector.broadcast %4 : vector<1x8xf32> to vector<16x8xf32>
    %6 = arith.addf %3, %5 : vector<16x8xf32>
    %7 = math.tanh %6 : vector<16x8xf32>
    %c0_6 = arith.constant 0 : index
    %c0_7 = arith.constant 0 : index
    %8 = vector.load %arg4[%c0_6, %c0_7] : memref<8x16xf32, #tpu.memory_space<vmem>>, vector<8x16xf32>
    %cst_8 = arith.constant dense<0.000000e+00> : vector<16x16xf32>
    %9 = tpu.matmul %7, %8, %cst_8 {dimension_numbers = #tpu.dot_dimension_numbers<[1], [0], [0], [1], [0, 0, 1, 1], [], []>} : vector<16x8xf32>, vector<8x16xf32>, vector<16x16xf32> -> vector<16x16xf32>
    %c0_9 = arith.constant 0 : index
    %c0_10 = arith.constant 0 : index
    %10 = vector.load %arg5[%c0_9, %c0_10] : memref<1x16xf32, #tpu.memory_space<vmem>>, vector<1x16xf32>
    %11 = vector.broadcast %10 : vector<1x16xf32> to vector<16x16xf32>
    %12 = arith.addf %9, %11 : vector<16x16xf32>
    %cst_11 = arith.constant dense<0xFF800000> : vector<16xf32>
    %13 = vector.multi_reduction <maximumf>, %12, %cst_11 [1] : vector<16x16xf32> to vector<16xf32>
    %14 = vector.shape_cast %13 : vector<16xf32> to vector<16x1xf32>
    %15 = vector.broadcast %14 : vector<16x1xf32> to vector<16x16xf32>
    %16 = arith.subf %12, %15 : vector<16x16xf32>
    %17 = math.exp %16 : vector<16x16xf32>
    %cst_12 = arith.constant dense<0.000000e+00> : vector<16xf32>
    %18 = vector.multi_reduction <add>, %17, %cst_12 [1] : vector<16x16xf32> to vector<16xf32>
    %19 = vector.shape_cast %18 : vector<16xf32> to vector<16x1xf32>
    %20 = vector.broadcast %19 : vector<16x1xf32> to vector<16x16xf32>
    %21 = arith.divf %17, %20 : vector<16x16xf32>
    %22 = arith.mulf %1, %21 : vector<16x16xf32>
    %c0_13 = arith.constant 0 : index
    %c0_14 = arith.constant 0 : index
    %23 = vector.load %arg6[%c0_13, %c0_14] : memref<16x32xf32, #tpu.memory_space<vmem>>, vector<16x32xf32>
    %cst_15 = arith.constant dense<0.000000e+00> : vector<16x32xf32>
    %24 = tpu.matmul %22, %23, %cst_15 {dimension_numbers = #tpu.dot_dimension_numbers<[1], [0], [0], [1], [0, 0, 1, 1], [], []>} : vector<16x16xf32>, vector<16x32xf32>, vector<16x32xf32> -> vector<16x32xf32>
    %c0_16 = arith.constant 0 : index
    %c0_17 = arith.constant 0 : index
    %25 = vector.load %arg7[%c0_16, %c0_17] : memref<1x32xf32, #tpu.memory_space<vmem>>, vector<1x32xf32>
    %26 = vector.broadcast %25 : vector<1x32xf32> to vector<16x32xf32>
    %27 = arith.addf %24, %26 : vector<16x32xf32>
    %cst_18 = arith.constant 0.000000e+00 : f32
    %28 = vector.broadcast %cst_18 : f32 to vector<16x32xf32>
    %29 = arith.maximumf %27, %28 : vector<16x32xf32>
    %c0_19 = arith.constant 0 : index
    %c0_20 = arith.constant 0 : index
    %30 = vector.load %arg8[%c0_19, %c0_20] : memref<32x32xf32, #tpu.memory_space<vmem>>, vector<32x32xf32>
    %cst_21 = arith.constant dense<0.000000e+00> : vector<16x32xf32>
    %31 = tpu.matmul %29, %30, %cst_21 {dimension_numbers = #tpu.dot_dimension_numbers<[1], [0], [0], [1], [0, 0, 1, 1], [], []>} : vector<16x32xf32>, vector<32x32xf32>, vector<16x32xf32> -> vector<16x32xf32>
    %c0_22 = arith.constant 0 : index
    %c0_23 = arith.constant 0 : index
    %32 = vector.load %arg9[%c0_22, %c0_23] : memref<1x32xf32, #tpu.memory_space<vmem>>, vector<1x32xf32>
    %33 = vector.broadcast %32 : vector<1x32xf32> to vector<16x32xf32>
    %34 = arith.addf %31, %33 : vector<16x32xf32>
    %cst_24 = arith.constant 0.000000e+00 : f32
    %35 = vector.broadcast %cst_24 : f32 to vector<16x32xf32>
    %36 = arith.maximumf %34, %35 : vector<16x32xf32>
    %c0_25 = arith.constant 0 : index
    %c0_26 = arith.constant 0 : index
    %37 = vector.load %arg10[%c0_25, %c0_26] : memref<32x16xf32, #tpu.memory_space<vmem>>, vector<32x16xf32>
    %cst_27 = arith.constant dense<0.000000e+00> : vector<16x16xf32>
    %38 = tpu.matmul %36, %37, %cst_27 {dimension_numbers = #tpu.dot_dimension_numbers<[1], [0], [0], [1], [0, 0, 1, 1], [], []>} : vector<16x32xf32>, vector<32x16xf32>, vector<16x16xf32> -> vector<16x16xf32>
    %c0_28 = arith.constant 0 : index
    %c0_29 = arith.constant 0 : index
    %39 = vector.load %arg11[%c0_28, %c0_29] : memref<1x16xf32, #tpu.memory_space<vmem>>, vector<1x16xf32>
    %40 = vector.broadcast %39 : vector<1x16xf32> to vector<16x16xf32>
    %41 = arith.addf %38, %40 : vector<16x16xf32>
    %cst_30 = arith.constant 0.000000e+00 : f32
    %42 = vector.broadcast %cst_30 : f32 to vector<16x16xf32>
    %43 = arith.maximumf %41, %42 : vector<16x16xf32>
    %c0_31 = arith.constant 0 : index
    %c0_32 = arith.constant 0 : index
    %44 = vector.load %arg12[%c0_31, %c0_32] : memref<16x15xf32, #tpu.memory_space<vmem>>, vector<16x15xf32>
    %cst_33 = arith.constant dense<0.000000e+00> : vector<16x15xf32>
    %45 = tpu.matmul %43, %44, %cst_33 {dimension_numbers = #tpu.dot_dimension_numbers<[1], [0], [0], [1], [0, 0, 1, 1], [], []>} : vector<16x16xf32>, vector<16x15xf32>, vector<16x15xf32> -> vector<16x15xf32>
    %c0_34 = arith.constant 0 : index
    %c0_35 = arith.constant 0 : index
    %46 = vector.load %arg13[%c0_34, %c0_35] : memref<1x15xf32, #tpu.memory_space<vmem>>, vector<1x15xf32>
    %47 = vector.broadcast %46 : vector<1x15xf32> to vector<16x15xf32>
    %48 = arith.addf %45, %47 : vector<16x15xf32>
    %49 = vector.extract_strided_slice %48 {offsets = [0, 0], sizes = [16, 5], strides = [1, 1]} : vector<16x15xf32> to vector<16x5xf32>
    %50 = vector.extract_strided_slice %48 {offsets = [0, 5], sizes = [16, 5], strides = [1, 1]} : vector<16x15xf32> to vector<16x5xf32>
    %51 = vector.extract_strided_slice %48 {offsets = [0, 10], sizes = [16, 5], strides = [1, 1]} : vector<16x15xf32> to vector<16x5xf32>
    %cst_36 = arith.constant dense<0xFF800000> : vector<16xf32>
    %52 = vector.multi_reduction <maximumf>, %49, %cst_36 [1] : vector<16x5xf32> to vector<16xf32>
    %53 = vector.shape_cast %52 : vector<16xf32> to vector<16x1xf32>
    %54 = vector.broadcast %53 : vector<16x1xf32> to vector<16x5xf32>
    %55 = arith.subf %49, %54 : vector<16x5xf32>
    %56 = math.exp %55 : vector<16x5xf32>
    %cst_37 = arith.constant dense<0.000000e+00> : vector<16xf32>
    %57 = vector.multi_reduction <add>, %56, %cst_37 [1] : vector<16x5xf32> to vector<16xf32>
    %58 = vector.shape_cast %57 : vector<16xf32> to vector<16x1xf32>
    %59 = vector.broadcast %58 : vector<16x1xf32> to vector<16x5xf32>
    %60 = arith.divf %56, %59 : vector<16x5xf32>
    %cst_38 = arith.constant 2.000000e+01 : f32
    %61 = vector.broadcast %cst_38 : f32 to vector<16x5xf32>
    %62 = arith.cmpf ogt, %51, %61 : vector<16x5xf32>
    %63 = math.exp %51 : vector<16x5xf32>
    %64 = math.log1p %63 : vector<16x5xf32>
    %65 = arith.select %62, %51, %64 : vector<16x5xi1>, vector<16x5xf32>
    %cst_39 = arith.constant 1.000000e-01 : f32
    %66 = vector.broadcast %cst_39 : f32 to vector<16x5xf32>
    %67 = arith.addf %65, %66 : vector<16x5xf32>
    %c0_40 = arith.constant 0 : index
    %c0_41 = arith.constant 0 : index
    %68 = vector.load %arg14[%c0_40, %c0_41] : memref<16x128xf32, #tpu.memory_space<vmem>>, vector<16x5xf32>
    tpu.vector_store %arg14[%c0_40, %c0_41], %60 {strides = array<i32>} : memref<16x128xf32, #tpu.memory_space<vmem>>, vector<16x5xf32>,
    %c0_42 = arith.constant 0 : index
    %c5 = arith.constant 5 : index
    %69 = vector.load %arg14[%c0_42, %c5] : memref<16x128xf32, #tpu.memory_space<vmem>>, vector<16x5xf32>
    tpu.vector_store %arg14[%c0_42, %c5], %50 {strides = array<i32>} : memref<16x128xf32, #tpu.memory_space<vmem>>, vector<16x5xf32>,
    %c0_43 = arith.constant 0 : index
    %c10 = arith.constant 10 : index
    %70 = vector.load %arg14[%c0_43, %c10] : memref<16x128xf32, #tpu.memory_space<vmem>>, vector<16x5xf32>
    tpu.vector_store %arg14[%c0_43, %c10], %67 {strides = array<i32>} : memref<16x128xf32, #tpu.memory_space<vmem>>, vector<16x5xf32>,
    %c0_44 = arith.constant 0 : index
    %c15 = arith.constant 15 : index
    %71 = vector.load %arg14[%c0_44, %c15] : memref<16x128xf32, #tpu.memory_space<vmem>>, vector<16x16xf32>
    tpu.vector_store %arg14[%c0_44, %c15], %21 {strides = array<i32>} : memref<16x128xf32, #tpu.memory_space<vmem>>, vector<16x16xf32>,
    %c0_45 = arith.constant 0 : index
    %c31 = arith.constant 31 : index
    %72 = vector.load %arg14[%c0_45, %c31] : memref<16x128xf32, #tpu.memory_space<vmem>>, vector<16x16xf32>
    tpu.vector_store %arg14[%c0_45, %c31], %43 {strides = array<i32>} : memref<16x128xf32, #tpu.memory_space<vmem>>, vector<16x16xf32>,
    %c1 = arith.constant 1 : index
    %c0_46 = arith.constant 0 : index
    %c0_47 = arith.constant 0 : index
    %73 = vector.load %arg1[%c1, %c0_46, %c0_47] : memref<2x16x16xf32, #tpu.memory_space<vmem>>, vector<1x16x16xf32>
    %74 = vector.shape_cast %73 : vector<1x16x16xf32> to vector<16x16xf32>
    %c0_48 = arith.constant 0 : index
    %c0_49 = arith.constant 0 : index
    %75 = vector.load %arg2[%c0_48, %c0_49] : memref<16x8xf32, #tpu.memory_space<vmem>>, vector<16x8xf32>
    %cst_50 = arith.constant dense<0.000000e+00> : vector<16x8xf32>
    %76 = tpu.matmul %74, %75, %cst_50 {dimension_numbers = #tpu.dot_dimension_numbers<[1], [0], [0], [1], [0, 0, 1, 1], [], []>} : vector<16x16xf32>, vector<16x8xf32>, vector<16x8xf32> -> vector<16x8xf32>
    %c0_51 = arith.constant 0 : index
    %c0_52 = arith.constant 0 : index
    %77 = vector.load %arg3[%c0_51, %c0_52] : memref<1x8xf32, #tpu.memory_space<vmem>>, vector<1x8xf32>
    %78 = vector.broadcast %77 : vector<1x8xf32> to vector<16x8xf32>
    %79 = arith.addf %76, %78 : vector<16x8xf32>
    %80 = math.tanh %79 : vector<16x8xf32>
    %c0_53 = arith.constant 0 : index
    %c0_54 = arith.constant 0 : index
    %81 = vector.load %arg4[%c0_53, %c0_54] : memref<8x16xf32, #tpu.memory_space<vmem>>, vector<8x16xf32>
    %cst_55 = arith.constant dense<0.000000e+00> : vector<16x16xf32>
    %82 = tpu.matmul %80, %81, %cst_55 {dimension_numbers = #tpu.dot_dimension_numbers<[1], [0], [0], [1], [0, 0, 1, 1], [], []>} : vector<16x8xf32>, vector<8x16xf32>, vector<16x16xf32> -> vector<16x16xf32>
    %c0_56 = arith.constant 0 : index
    %c0_57 = arith.constant 0 : index
    %83 = vector.load %arg5[%c0_56, %c0_57] : memref<1x16xf32, #tpu.memory_space<vmem>>, vector<1x16xf32>
    %84 = vector.broadcast %83 : vector<1x16xf32> to vector<16x16xf32>
    %85 = arith.addf %82, %84 : vector<16x16xf32>
    %cst_58 = arith.constant dense<0xFF800000> : vector<16xf32>
    %86 = vector.multi_reduction <maximumf>, %85, %cst_58 [1] : vector<16x16xf32> to vector<16xf32>
    %87 = vector.shape_cast %86 : vector<16xf32> to vector<16x1xf32>
    %88 = vector.broadcast %87 : vector<16x1xf32> to vector<16x16xf32>
    %89 = arith.subf %85, %88 : vector<16x16xf32>
    %90 = math.exp %89 : vector<16x16xf32>
    %cst_59 = arith.constant dense<0.000000e+00> : vector<16xf32>
    %91 = vector.multi_reduction <add>, %90, %cst_59 [1] : vector<16x16xf32> to vector<16xf32>
    %92 = vector.shape_cast %91 : vector<16xf32> to vector<16x1xf32>
    %93 = vector.broadcast %92 : vector<16x1xf32> to vector<16x16xf32>
    %94 = arith.divf %90, %93 : vector<16x16xf32>
    %95 = arith.mulf %74, %94 : vector<16x16xf32>
    %c0_60 = arith.constant 0 : index
    %c0_61 = arith.constant 0 : index
    %96 = vector.load %arg6[%c0_60, %c0_61] : memref<16x32xf32, #tpu.memory_space<vmem>>, vector<16x32xf32>
    %cst_62 = arith.constant dense<0.000000e+00> : vector<16x32xf32>
    %97 = tpu.matmul %95, %96, %cst_62 {dimension_numbers = #tpu.dot_dimension_numbers<[1], [0], [0], [1], [0, 0, 1, 1], [], []>} : vector<16x16xf32>, vector<16x32xf32>, vector<16x32xf32> -> vector<16x32xf32>
    %c0_63 = arith.constant 0 : index
    %c0_64 = arith.constant 0 : index
    %98 = vector.load %arg7[%c0_63, %c0_64] : memref<1x32xf32, #tpu.memory_space<vmem>>, vector<1x32xf32>
    %99 = vector.broadcast %98 : vector<1x32xf32> to vector<16x32xf32>
    %100 = arith.addf %97, %99 : vector<16x32xf32>
    %cst_65 = arith.constant 0.000000e+00 : f32
    %101 = vector.broadcast %cst_65 : f32 to vector<16x32xf32>
    %102 = arith.maximumf %100, %101 : vector<16x32xf32>
    %c0_66 = arith.constant 0 : index
    %c0_67 = arith.constant 0 : index
    %103 = vector.load %arg8[%c0_66, %c0_67] : memref<32x32xf32, #tpu.memory_space<vmem>>, vector<32x32xf32>
    %cst_68 = arith.constant dense<0.000000e+00> : vector<16x32xf32>
    %104 = tpu.matmul %102, %103, %cst_68 {dimension_numbers = #tpu.dot_dimension_numbers<[1], [0], [0], [1], [0, 0, 1, 1], [], []>} : vector<16x32xf32>, vector<32x32xf32>, vector<16x32xf32> -> vector<16x32xf32>
    %c0_69 = arith.constant 0 : index
    %c0_70 = arith.constant 0 : index
    %105 = vector.load %arg9[%c0_69, %c0_70] : memref<1x32xf32, #tpu.memory_space<vmem>>, vector<1x32xf32>
    %106 = vector.broadcast %105 : vector<1x32xf32> to vector<16x32xf32>
    %107 = arith.addf %104, %106 : vector<16x32xf32>
    %cst_71 = arith.constant 0.000000e+00 : f32
    %108 = vector.broadcast %cst_71 : f32 to vector<16x32xf32>
    %109 = arith.maximumf %107, %108 : vector<16x32xf32>
    %c0_72 = arith.constant 0 : index
    %c0_73 = arith.constant 0 : index
    %110 = vector.load %arg10[%c0_72, %c0_73] : memref<32x16xf32, #tpu.memory_space<vmem>>, vector<32x16xf32>
    %cst_74 = arith.constant dense<0.000000e+00> : vector<16x16xf32>
    %111 = tpu.matmul %109, %110, %cst_74 {dimension_numbers = #tpu.dot_dimension_numbers<[1], [0], [0], [1], [0, 0, 1, 1], [], []>} : vector<16x32xf32>, vector<32x16xf32>, vector<16x16xf32> -> vector<16x16xf32>
    %c0_75 = arith.constant 0 : index
    %c0_76 = arith.constant 0 : index
    %112 = vector.load %arg11[%c0_75, %c0_76] : memref<1x16xf32, #tpu.memory_space<vmem>>, vector<1x16xf32>
    %113 = vector.broadcast %112 : vector<1x16xf32> to vector<16x16xf32>
    %114 = arith.addf %111, %113 : vector<16x16xf32>
    %cst_77 = arith.constant 0.000000e+00 : f32
    %115 = vector.broadcast %cst_77 : f32 to vector<16x16xf32>
    %116 = arith.maximumf %114, %115 : vector<16x16xf32>
    %c0_78 = arith.constant 0 : index
    %c0_79 = arith.constant 0 : index
    %117 = vector.load %arg12[%c0_78, %c0_79] : memref<16x15xf32, #tpu.memory_space<vmem>>, vector<16x15xf32>
    %cst_80 = arith.constant dense<0.000000e+00> : vector<16x15xf32>
    %118 = tpu.matmul %116, %117, %cst_80 {dimension_numbers = #tpu.dot_dimension_numbers<[1], [0], [0], [1], [0, 0, 1, 1], [], []>} : vector<16x16xf32>, vector<16x15xf32>, vector<16x15xf32> -> vector<16x15xf32>
    %c0_81 = arith.constant 0 : index
    %c0_82 = arith.constant 0 : index
    %119 = vector.load %arg13[%c0_81, %c0_82] : memref<1x15xf32, #tpu.memory_space<vmem>>, vector<1x15xf32>
    %120 = vector.broadcast %119 : vector<1x15xf32> to vector<16x15xf32>
    %121 = arith.addf %118, %120 : vector<16x15xf32>
    %122 = vector.extract_strided_slice %121 {offsets = [0, 0], sizes = [16, 5], strides = [1, 1]} : vector<16x15xf32> to vector<16x5xf32>
    %123 = vector.extract_strided_slice %121 {offsets = [0, 5], sizes = [16, 5], strides = [1, 1]} : vector<16x15xf32> to vector<16x5xf32>
    %124 = vector.extract_strided_slice %121 {offsets = [0, 10], sizes = [16, 5], strides = [1, 1]} : vector<16x15xf32> to vector<16x5xf32>
    %cst_83 = arith.constant dense<0xFF800000> : vector<16xf32>
    %125 = vector.multi_reduction <maximumf>, %122, %cst_83 [1] : vector<16x5xf32> to vector<16xf32>
    %126 = vector.shape_cast %125 : vector<16xf32> to vector<16x1xf32>
    %127 = vector.broadcast %126 : vector<16x1xf32> to vector<16x5xf32>
    %128 = arith.subf %122, %127 : vector<16x5xf32>
    %129 = math.exp %128 : vector<16x5xf32>
    %cst_84 = arith.constant dense<0.000000e+00> : vector<16xf32>
    %130 = vector.multi_reduction <add>, %129, %cst_84 [1] : vector<16x5xf32> to vector<16xf32>
    %131 = vector.shape_cast %130 : vector<16xf32> to vector<16x1xf32>
    %132 = vector.broadcast %131 : vector<16x1xf32> to vector<16x5xf32>
    %133 = arith.divf %129, %132 : vector<16x5xf32>
    %cst_85 = arith.constant 2.000000e+01 : f32
    %134 = vector.broadcast %cst_85 : f32 to vector<16x5xf32>
    %135 = arith.cmpf ogt, %124, %134 : vector<16x5xf32>
    %136 = math.exp %124 : vector<16x5xf32>
    %137 = math.log1p %136 : vector<16x5xf32>
    %138 = arith.select %135, %124, %137 : vector<16x5xi1>, vector<16x5xf32>
    %cst_86 = arith.constant 1.000000e-01 : f32
    %139 = vector.broadcast %cst_86 : f32 to vector<16x5xf32>
    %140 = arith.addf %138, %139 : vector<16x5xf32>
    %c0_87 = arith.constant 0 : index
    %c64 = arith.constant 64 : index
    %141 = vector.load %arg14[%c0_87, %c64] : memref<16x128xf32, #tpu.memory_space<vmem>>, vector<16x5xf32>
    tpu.vector_store %arg14[%c0_87, %c64], %133 {strides = array<i32>} : memref<16x128xf32, #tpu.memory_space<vmem>>, vector<16x5xf32>,
    %c0_88 = arith.constant 0 : index
    %c69 = arith.constant 69 : index
    %142 = vector.load %arg14[%c0_88, %c69] : memref<16x128xf32, #tpu.memory_space<vmem>>, vector<16x5xf32>
    tpu.vector_store %arg14[%c0_88, %c69], %123 {strides = array<i32>} : memref<16x128xf32, #tpu.memory_space<vmem>>, vector<16x5xf32>,
    %c0_89 = arith.constant 0 : index
    %c74 = arith.constant 74 : index
    %143 = vector.load %arg14[%c0_89, %c74] : memref<16x128xf32, #tpu.memory_space<vmem>>, vector<16x5xf32>
    tpu.vector_store %arg14[%c0_89, %c74], %140 {strides = array<i32>} : memref<16x128xf32, #tpu.memory_space<vmem>>, vector<16x5xf32>,
    %c0_90 = arith.constant 0 : index
    %c79 = arith.constant 79 : index
    %144 = vector.load %arg14[%c0_90, %c79] : memref<16x128xf32, #tpu.memory_space<vmem>>, vector<16x16xf32>
    tpu.vector_store %arg14[%c0_90, %c79], %94 {strides = array<i32>} : memref<16x128xf32, #tpu.memory_space<vmem>>, vector<16x16xf32>,
    %c0_91 = arith.constant 0 : index
    %c95 = arith.constant 95 : index
    %145 = vector.load %arg14[%c0_91, %c95] : memref<16x128xf32, #tpu.memory_space<vmem>>, vector<16x16xf32>
    tpu.vector_store %arg14[%c0_91, %c95], %116 {strides = array<i32>} : memref<16x128xf32, #tpu.memory_space<vmem>>, vector<16x16xf32>,
    return
  }
  func.func @transform_0(%arg0: i32) -> (i32, i32, i32) {
    %c0_i32 = arith.constant 0 : i32
    %c0_i32_0 = arith.constant 0 : i32
    %c0_i32_1 = arith.constant 0 : i32
    return %c0_i32, %arg0, %c0_i32_0 : i32, i32, i32
  }
  func.func @transform_1(%arg0: i32) -> (i32, i32) {
    %c0_i32 = arith.constant 0 : i32
    %c0_i32_0 = arith.constant 0 : i32
    %c0_i32_1 = arith.constant 0 : i32
    return %c0_i32, %c0_i32_0 : i32, i32
  }
  func.func @transform_2(%arg0: i32) -> (i32, i32) {
    %c0_i32 = arith.constant 0 : i32
    %c0_i32_0 = arith.constant 0 : i32
    %c0_i32_1 = arith.constant 0 : i32
    return %c0_i32, %c0_i32_0 : i32, i32
  }
  func.func @transform_3(%arg0: i32) -> (i32, i32) {
    %c0_i32 = arith.constant 0 : i32
    %c0_i32_0 = arith.constant 0 : i32
    %c0_i32_1 = arith.constant 0 : i32
    return %c0_i32, %c0_i32_0 : i32, i32
  }
  func.func @transform_4(%arg0: i32) -> (i32, i32) {
    %c0_i32 = arith.constant 0 : i32
    %c0_i32_0 = arith.constant 0 : i32
    %c0_i32_1 = arith.constant 0 : i32
    return %c0_i32, %c0_i32_0 : i32, i32
  }
  func.func @transform_5(%arg0: i32) -> (i32, i32) {
    %c0_i32 = arith.constant 0 : i32
    %c0_i32_0 = arith.constant 0 : i32
    %c0_i32_1 = arith.constant 0 : i32
    return %c0_i32, %c0_i32_0 : i32, i32
  }
  func.func @transform_6(%arg0: i32) -> (i32, i32) {
    %c0_i32 = arith.constant 0 : i32
    %c0_i32_0 = arith.constant 0 : i32
    %c0_i32_1 = arith.constant 0 : i32
    return %c0_i32, %c0_i32_0 : i32, i32
  }
  func.func @transform_7(%arg0: i32) -> (i32, i32) {
    %c0_i32 = arith.constant 0 : i32
    %c0_i32_0 = arith.constant 0 : i32
    %c0_i32_1 = arith.constant 0 : i32
    return %c0_i32, %c0_i32_0 : i32, i32
  }
  func.func @transform_8(%arg0: i32) -> (i32, i32) {
    %c0_i32 = arith.constant 0 : i32
    %c0_i32_0 = arith.constant 0 : i32
    %c0_i32_1 = arith.constant 0 : i32
    return %c0_i32, %c0_i32_0 : i32, i32
  }
  func.func @transform_9(%arg0: i32) -> (i32, i32) {
    %c0_i32 = arith.constant 0 : i32
    %c0_i32_0 = arith.constant 0 : i32
    %c0_i32_1 = arith.constant 0 : i32
    return %c0_i32, %c0_i32_0 : i32, i32
  }
  func.func @transform_10(%arg0: i32) -> (i32, i32) {
    %c0_i32 = arith.constant 0 : i32
    %c0_i32_0 = arith.constant 0 : i32
    %c0_i32_1 = arith.constant 0 : i32
    return %c0_i32, %c0_i32_0 : i32, i32
  }
  func.func @transform_11(%arg0: i32) -> (i32, i32) {
    %c0_i32 = arith.constant 0 : i32
    %c0_i32_0 = arith.constant 0 : i32
    %c0_i32_1 = arith.constant 0 : i32
    return %c0_i32, %c0_i32_0 : i32, i32
  }
  func.func @transform_12(%arg0: i32) -> (i32, i32) {
    %c0_i32 = arith.constant 0 : i32
    %c0_i32_0 = arith.constant 0 : i32
    %c0_i32_1 = arith.constant 0 : i32
    return %c0_i32, %c0_i32_0 : i32, i32
  }
  func.func @transform_13(%arg0: i32) -> (i32, i32) {
    %c0_i32 = arith.constant 0 : i32
    %c0_i32_0 = arith.constant 0 : i32
    return %arg0, %c0_i32 : i32, i32
  }
}

</mosaic_0001>

<bundles_post_ra>
// kernel: mdn_forward_packed.1
= control target key start
LH: loop header
LB: loop body
LE: loop exit
PB: predicated region body
PF: predicated region fallthrough
CT: control target
= control target key end

     0   :  { %s2061_s0 = inlined_call_operand.vmem [shape: f32[2,32,16], index: 0, kind: input, shape index: {}]   ;;  %s2062_s1 = inlined_call_operand.vmem [shape: f32[16,8], index: 1, kind: input, shape index: {}]   ;;  %s2063_s2 = inlined_call_operand.vmem [shape: f32[1,8], index: 2, kind: input, shape index: {}]   ;;  %s2064_s3 = inlined_call_operand.vmem [shape: f32[8,16], index: 3, kind: input, shape index: {}]   ;;  %s2065_s4 = inlined_call_operand.vmem [shape: f32[1,16], index: 4, kind: input, shape index: {}]   ;;  %s2066_s5 = inlined_call_operand.vmem [shape: f32[16,32], index: 5, kind: input, shape index: {}]   ;;  %s2067_s6 = inlined_call_operand.vmem [shape: f32[1,32], index: 6, kind: input, shape index: {}]   ;;  %s2068_s7 = inlined_call_operand.vmem [shape: f32[32,32], index: 7, kind: input, shape index: {}]   ;;  %s2069_s8 = inlined_call_operand.vmem [shape: f32[1,32], index: 8, kind: input, shape index: {}]   ;;  %s2070_s9 = inlined_call_operand.vmem [shape: f32[32,16], index: 9, kind: input, shape index: {}]   ;;  %s2071_s10 = inlined_call_operand.vmem [shape: f32[1,16], index: 10, kind: input, shape index: {}]   ;;  %s2072_s11 = inlined_call_operand.vmem [shape: f32[16,15], index: 11, kind: input, shape index: {}]   ;;  %s2073_s12 = inlined_call_operand.vmem [shape: f32[1,15], index: 12, kind: input, shape index: {}]   ;;  %s2074_s13 = inlined_call_operand.hbm [shape: f32[32,128], index: 13, kind: output, shape index: {}]  }
   0x1   :  { %2075 = sst [smem:[#allocation6_spill]] %s2061_s0 }
   0x2   :  { %2076 = sst [smem:[#allocation7_spill]] %s2062_s1 }
   0x3   :  { %2077 = sst [smem:[#allocation8_spill]] %s2063_s2 }
   0x4   :  { %2078 = sst [smem:[#allocation9_spill]] %s2064_s3 }
   0x5   :  { %18 = vsyncpa [#allocation4], 0 }
   0x6   :  { %20 = vsyncpa [#allocation4 + $0x1], 0  ;;  %s1654_s25 = smov 0   ;;  %s1656_s26 = smov 0  }
   0x7   :  { %s1658_s27 = smov 0   ;;  %s1660_s28 = smov 0  }
   0x8 LB: > { %s1356_s29 = sadd.s32 4294967295, %s1575_s28   ;;  %s1357_s30 = sadd.s32 4294967294, %s1575_s28   ;;  %s1575_s28 = sphi %s1660_s28, %s2090_s28   ;;  %s1571_s27 = sphi %s1658_s27, %s2089_s27   ;;  %s1567_s26 = sphi %s1656_s26, %s2088_s26   ;;  %s1563_s25 = sphi %s1654_s25, %s2087_s25  }
   0x9   : > { %s1677_s14 = sadd.s32 1, %s1575_s28   ;;  %s33_s15 = sadd.s32 1, %s1571_s27 }
   0xa   : > { %s30_s16 = ssub.s32 %s1575_s28, %s1677_s14  ;;  %p40_p0 = scmp.ne.s32.totalorder %s1571_s27, %s1567_s26 }
   0xb   : > { %p31_p1 = scmp.eq.s32.totalorder %s30_s16, 0  ;;  %p41_p2 = scmp.eq.s32.totalorder %s1575_s28, 0 }
   0xc   : > { %p322_p3 = scmp.eq.s32.totalorder %s1356_s29, 1  ;;  %p327_p4 = scmp.ne.s32.totalorder %s1567_s26, %s1563_s25 }
   0xd   : > { %s1690_s17 = scalar_select %p31_p1, %s1571_s27, %s33_s15  }
   0xe   : > { %p42_p5 = por %p41_p2, %p40_p0  ;;  %p1692_p6 = por %p322_p3, %p40_p0 }
   0xf   : > { %p328_p7 = scmp.eq.s32.totalorder %s1357_s30, 1  ;;  %p1359_p9 = scmp.ge.s32.totalorder %s1575_s28, 2 }
  0x11   : > { %p1696_p8 = por %p328_p7, %p327_p4  ;;  %380 = sbr.rel (%p1359_p9) target bundleno = 36 (0x24), region = 64 }
  0x16   : > { %383 = sbr.rel (!%p42_p5) target bundleno = 36 (0x24), region = 68  ;;  %s385_s20 = sand.u32 (%p42_p5), 1, %s1571_s27  }
  0x17   : > { %s1397_s21 = sshll.u32 (%p42_p5), %s1575_s28, 4  ;;  %s1360_s22 = sshll.u32 (%p42_p5), %s385_s20, 5 }
  0x18   : > { %s2081_s0 = sld [smem:[#allocation6_spill]] (%p42_p5)  ;;  %s387_s30 = scalar_lea.vmem (%p42_p5), [#allocation2], %s1360_s22 }
  0x1e   : > { %s390_s15 = scalar_lea.vmem %s2081_s0, %s1397_s21 }
  0x1f   : > { %v425_v0 = vld [vmem:[%s390_s15] sm:$0xff]  ;;  %v427_v1 = vld [vmem:[%s390_s15 + $0x8] sm:$0xff] }
  0x20   : > { %v429_v2 = vld [vmem:[%s390_s15 + $0x20] sm:$0xff]  ;;  %426 = vst [vmem:[%s387_s30] sm:$0xff] %v425_v0  ;;  %v431_v3 = vld [vmem:[%s390_s15 + $0x28] sm:$0xff] }
  0x21   : > { %428 = vst [vmem:[%s387_s30 + $0x8] sm:$0xff] %v427_v1 }
  0x22   : > { %430 = vst [vmem:[%s387_s30 + $0x10] sm:$0xff] %v429_v2 }
  0x23   : > { %432 = vst [vmem:[%s387_s30 + $0x18] sm:$0xff] %v431_v3 }
  0x24 PF: > { %p1363_p10 = scmp.ge.s32.totalorder %s1575_s28, 1  ;;  %p437_p11 = scmp.lt.s32.totalorder %s1575_s28, 3 }
  0x26   : > { %p438_p12 = pnand %p1363_p10, %p437_p11 }
  0x27   : > { %s2082_s1 = sld [smem:[#allocation7_spill]] (!%p438_p12)  ;;  %s1717_s23 = sand.u32 (!%p438_p12), 1, %s1567_s26  }
  0x28   : > { %441 = sbr.rel (%p438_p12) target bundleno = 2072 (0x818), region = 106  ;;  %s1364_s24 = sshll.u32 (!%p438_p12), %s1717_s23, 5 }
  0x29   : > { %s1720_s15 = scalar_lea.vmem (!%p438_p12), [#allocation2], %s1364_s24  ;;  %s2083_s3 = sld [smem:[#allocation9_spill]] (!%p438_p12) }
  0x2a   : > { %s2084_s2 = sld [smem:[#allocation8_spill]] (!%p438_p12)  ;;  %s1577_s20 = smov (!%p438_p12), 15  }
  0x2b   : > { %s1579_s24 = smov (!%p438_p12), 64   ;;  %s1365_s30 = sshll.u32 (!%p438_p12), %s1717_s23, 4 }
  0x2c   : > { %s1964_s16 = scalar_lea.vmem (!%p438_p12), [#allocation3], %s1365_s30  ;;  %s1581_s21 = smov (!%p438_p12), 79  }
  0x2d   : > { %v492_v4 = vld [vmem:[%s2082_s1 + $0x8] sm:$0xff]  ;;  %v491_v5 = vld [vmem:[%s2082_s1] sm:$0xff]  ;;  %vm497_vm0 = vcmask 130048   ;;  %vm534_vm1 = vcmask 64512   ;;  %v1765_v44 = vld [vmem:[%s2068_s7 + $0x18] sm:$0xff]  ;;  %vm659_vm10 = vcmask 261120  }
  0x2e   : > { %518 = vmatpush.msra.mxu0 %v492_v4  ;;  %v1723_v6 = vld [vmem:[%s1720_s15] sm:$0xff]  ;;  %v1728_v7 = vld [vmem:[%s1720_s15 + $0x8] sm:$0xff]  ;;  %678 = vmatpush.msra.mxu3 %v1765_v44  ;;  %v1779_v62 = vld [vmem:[%s1720_s15 + $0x10] sm:$0xff]  ;;  %vm765_vm11 = vcmask 39936   ;;  %s1398_s22 = sshll.u32 %s1356_s29, 4  ;;  %s1286_s30 = sshll.u32 %s1964_s16, 4  ;;  %s1287_s30 = int_to_ptr.vmem [resolvable:$true] %s1286_s30 }
  0x2f   : > { %v1735_v8 = vld [vmem:[%s2083_s3] sm:$0xff]  ;;  %v1753_v33 = vld [vmem:[%s2066_s5 + $0x8] sm:$0xff]  ;;  %v1784_v63 = vld [vmem:[%s1720_s15 + $0x18] sm:$0xff]  ;;  %s1578_s15 = smov 31   ;;  %s1274_s29 = scalar_lea.sflag [#allocation4], %s1717_s23 }
  0x30   : > { %519 = vmatpush.msra.mxu0 %v491_v5  ;;  %556 = vmatpush.msra.mxu1 %v1735_v8  ;;  %v1445_v9 = vld [vmem:[%s2084_s2] ss:$0 sm:$0xff]  ;;  %v1791_v0 = vld [vmem:[%s2068_s7 + $0x10] sm:$0xff]  ;;  %v1797_v1 = vld [vmem:[%s2068_s7 + $0x8] sm:$0xff]  ;;  %s1533_s1 = scalar_lea.hbm %s2074_s13, 32 }
  0x31   : > { %1366 = vmatmul.msk.f32.vlgmr.msra.gmra.mxu0 %vm497_vm0, %v1723_v6  ;;  %v1446_v16 = vld [vmem:[%s2065_s4] ss:$0 sm:$0xff]  ;;  %640 = vmatpush.msra.mxu2 %v1753_v33 }
  0x32   : > { %v1759_v34 = vld [vmem:[%s2066_s5] sm:$0xff]  ;;  %679 = vmatpush.msra.mxu3 %v1791_v0 }
  0x33   : > { %641 = vmatpush.msra.mxu2 %v1759_v34  ;;  %v1803_v2 = vld [vmem:[%s2068_s7] sm:$0xff] }
  0x34   : > { %680 = vmatpush.msra.mxu3 %v1797_v1  ;;  %v1447_v3 = vld [vmem:[%s2067_s6] ss:$0 sm:$0xff] }
  0x35   : > { %899 = vmatpush.msrb.mxu2 %v492_v4 }
  0x36   : > { %681 = vmatpush.msra.mxu3 %v1803_v2 }
  0x37   : > { %900 = vmatpush.msrb.mxu2 %v491_v5 }
  0x38   : > { %936 = vmatpush.msrb.mxu3 %v1735_v8  ;;  %v1448_v8 = vld [vmem:[%s2084_s2] ss:$0 sm:$0xff] }
  0x39   : > { %1367 = vmatmul.msk.f32.gmra.mxu0 %vm497_vm0, %v1728_v7 }
  0xae   : > { %v521_v10 = vpop.f32.mrf.mxu0 }
  0xaf   : > { %v522_v11 = vadd.f32 %v1445_v9, %v521_v10 }
  0xb1   : > { %1457 = vtanh.f32 %v522_v11 }
  0xb6   : > { %v524_v12 = vpop.f32.mrf.mxu0 }
  0xb7   : > { %v1458_v13 = vpop.eup %1457  ;;  %v525_v14 = vadd.f32 %v1445_v9, %v524_v12 }
  0xb8   : > { %1368 = vmatmul.msk.f32.vlgmr.msra.gmra.mxu1 %vm534_vm1, %v1458_v13 }
  0xb9   : > { %1459 = vtanh.f32 %v525_v14 }
  0xbf   : > { %v1460_v15 = vpop.eup %1459 }
  0xc0   : > { %1369 = vmatmul.msk.f32.gmra.mxu1 %vm534_vm1, %v1460_v15 }
 0x135   : > { %v558_v17 = vpop.f32.mrf.mxu1 }
 0x136   : > { %v559_v18 = vadd.f32 %v1446_v16, %v558_v17 }
 0x138   : > { %v564_v19 = vsel %vm497_vm0, %v559_v18, -inf }
 0x139   : > { %565 = vmax.xlane.f32.xlu0 %v564_v19  ;;  %v692_v19 = vld [vmem:[%s2070_s9 + $0x8] sm:$0xff] }
 0x13d   : > { %v561_v20 = vpop.f32.mrf.mxu1 }
 0x13e   : > { %v562_v21 = vadd.f32 %v1446_v16, %v561_v20  ;;  %v691_v20 = vld [vmem:[%s2070_s9] sm:$0xff] }
 0x140   : > { %v567_v22 = vsel %vm497_vm0, %v562_v21, -inf }
 0x141   : > { %568 = vmax.xlane.f32.xlu0 %v567_v22 }
 0x1ac   : > { %v566_v23 = vpop.xlane.xlu0 %565 }
 0x1ad   : > { %v570_v24 = vsub.f32 %v559_v18, %v566_v23  ;;  %v693_v18 = vld [vmem:[%s2070_s9 + $0x10] sm:$0xff] }
 0x1af   : > { %v572_v25 = vmul.f32 1.442695, %v570_v24 }
 0x1b1   : > { %1461 = vpow2.f32 %v572_v25 }
 0x1b4   : > { %v569_v26 = vpop.xlane.xlu0 %568 }
 0x1b5   : > { %v571_v27 = vsub.f32 %v562_v21, %v569_v26  ;;  %v1449_v21 = vld [vmem:[%s2069_s8] ss:$0 sm:$0xff] }
 0x1b7   : > { %v1462_v28 = vpop.eup %1461  ;;  %v574_v29 = vmul.f32 1.442695, %v571_v27 }
 0x1b8   : > { %v576_v30 = vsel %vm497_vm0, %v1462_v28, 0.0 }
 0x1b9   : > { %1463 = vpow2.f32 %v574_v29  ;;  %577 = vadd.xlane.f32.xlu1 %v576_v30 }
 0x1bf   : > { %v1464_v31 = vpop.eup %1463 }
 0x1c0   : > { %v579_v32 = vsel %vm497_vm0, %v1464_v31, 0.0 }
 0x1c1   : > { %580 = vadd.xlane.f32.xlu1 %v579_v32 }
 0x22c   : > { %v578_v35 = vpop.xlane.xlu1 %577 }
 0x22d   : > { %1465 = vrcp.f32 %v578_v35  ;;  %v593_v40 = vand.u32 2147483648, %v578_v35  ;;  %v591_v42 = vand.u32 2147483647, %v578_v35  ;;  %vm587_vm3 = vweird.f32 %v578_v35 }
 0x22f   : > { %v594_v46 = vor.u32 1.1754944e-38, %v593_v40  ;;  %vm592_vm5 = vcmp.eq.f32.partialorder %v591_v42, 8.507059e+37 }
 0x233   : > { %v1466_v36 = vpop.eup %1465 }
 0x234   : > { %v583_v37 = vmul.f32 %v1466_v36, %v578_v35  ;;  %v581_v38 = vpop.xlane.xlu1 %580  ;;  %vm588_vm2 = vweird.f32 %v1466_v36  ;;  %v731_v35 = vld [vmem:[%s2072_s11 + $0x8] sm:$0xff] }
 0x235   : > { %1467 = vrcp.f32 %v581_v38  ;;  %vm589_vm4 = vmor %vm587_vm3, %vm588_vm2  ;;  %v608_v52 = vand.u32 2147483648, %v581_v38  ;;  %v606_v54 = vand.u32 2147483647, %v581_v38  ;;  %vm602_vm7 = vweird.f32 %v581_v38  ;;  %756 = vmatpush.msrb.mxu0 %v731_v35 }
 0x236   : > { %v584_v39 = vsub.f32 1.0, %v583_v37  ;;  %v1451_v37 = vld [vmem:[%s2071_s10] ss:$0 sm:$0xff] }
 0x237   : > { %v609_v57 = vor.u32 1.1754944e-38, %v608_v52  ;;  %vm607_vm9 = vcmp.eq.f32.partialorder %v606_v54, 8.507059e+37 }
 0x238   : > { %v585_v41 = vmul.f32 %v1466_v36, %v584_v39 }
 0x23a   : > { %v586_v43 = vadd.f32 %v1466_v36, %v585_v41 }
 0x23b   : > { %v1468_v45 = vpop.eup %1467 }
 0x23c   : > { %v598_v47 = vmul.f32 %v1468_v45, %v581_v38  ;;  %v590_v48 = vsel %vm589_vm4, %v1466_v36, %v586_v43  ;;  %vm603_vm6 = vweird.f32 %v1468_v45  ;;  %v730_v36 = vld [vmem:[%s2072_s11] sm:$0xff] }
 0x23d   : > { %v595_v49 = vsel %vm592_vm5, %v594_v46, %v590_v48  ;;  %vm604_vm8 = vmor %vm602_vm7, %vm603_vm6  ;;  %757 = vmatpush.msrb.mxu0 %v730_v36 }
 0x23e   : > { %v599_v50 = vsub.f32 1.0, %v598_v47  ;;  %v1768_v51 = vmul.f32 %v1462_v28, %v595_v49  ;;  %v1450_v28 = vld [vmem:[%s2065_s4] ss:$0 sm:$0xff] }
 0x23f   : > { %1057 = vmatpush.msra.mxu0 %v1765_v44 }
 0x240   : > { %v600_v53 = vmul.f32 %v1468_v45, %v599_v50  ;;  %v612_v55 = vmul.f32 %v1768_v51, %v1723_v6  ;;  %v694_v6 = vld [vmem:[%s2070_s9 + $0x18] sm:$0xff] }
 0x241   : > { %717 = vmatpush.msrb.mxu1 %v694_v6  ;;  %1058 = vmatpush.msra.mxu0 %v1791_v0 }
 0x242   : > { %v601_v56 = vadd.f32 %v1468_v45, %v600_v53  ;;  %1370 = vmatmul.msk.f32.vlgmr.msra.gmra.mxu2 %vm497_vm0, %v612_v55  ;;  %v1871_v55 = vld [vmem:[%s2073_s12] ss:$0 sm:$0xff] }
 0x243   : > { %1096 = vmatpush.msra.mxu2 %v694_v6  ;;  %718 = vmatpush.msrb.mxu1 %v693_v18 }
 0x244   : > { %v605_v58 = vsel %vm604_vm8, %v1468_v45, %v601_v56  ;;  %1059 = vmatpush.msra.mxu0 %v1797_v1 }
 0x245   : > { %v610_v59 = vsel %vm607_vm9, %v609_v57, %v605_v58  ;;  %1097 = vmatpush.msra.mxu2 %v693_v18  ;;  %719 = vmatpush.msrb.mxu1 %v692_v19 }
 0x246   : > { %v1773_v60 = vmul.f32 %v1464_v31, %v610_v59  ;;  %1060 = vmatpush.msra.mxu0 %v1803_v2 }
 0x247   : > { %1098 = vmatpush.msra.mxu2 %v692_v19  ;;  %720 = vmatpush.msrb.mxu1 %v691_v20 }
 0x248   : > { %v613_v61 = vmul.f32 %v1773_v60, %v1728_v7 }
 0x249   : > { %1099 = vmatpush.msra.mxu2 %v691_v20  ;;  %1020 = vmatpush.msra.mxu1 %v1753_v33 }
 0x24a   : > { %1371 = vmatmul.msk.f32.gmra.mxu2 %vm497_vm0, %v613_v61 }
 0x24b   : > { %1021 = vmatpush.msra.mxu1 %v1759_v34 }
 0x252   : > { %1380 = vmatmul.msk.f32.vlgmr.msrb.gmra.mxu2 %vm497_vm0, %v1779_v62 }
 0x25a   : > { %1381 = vmatmul.msk.f32.gmra.mxu2 %vm497_vm0, %v1784_v63 }
 0x2c5   : > { %v643_v4 = vpop.f32.mrf.mxu2 }
 0x2c6   : > { %v644_v5 = vadd.f32 %v1447_v3, %v643_v4 }
 0x2c8   : > { %v649_v7 = vmax.f32 %v644_v5, 0.0 }
 0x2ca   : > { %1372 = vmatmul.msk.f32.vlgmr.msra.gmra.mxu3 %vm659_vm10, %v649_v7 }
 0x2cb   : > { %1135 = vmatpush.msra.mxu3 %v731_v35 }
 0x2cd   : > { %v646_v9 = vpop.f32.mrf.mxu2  ;;  %1136 = vmatpush.msra.mxu3 %v730_v36  ;;  %v1455_v36 = vld [vmem:[%s2071_s10] ss:$0 sm:$0xff] }
 0x2ce   : > { %v647_v10 = vadd.f32 %v1447_v3, %v646_v9 }
 0x2d0   : > { %v650_v11 = vmax.f32 %v647_v10, 0.0 }
 0x2d2   : > { %1373 = vmatmul.msk.f32.gmra.mxu3 %vm659_vm10, %v650_v11 }
 0x2d5   : > { %v902_v12 = vpop.f32.mrf.mxu2 }
 0x2d6   : > { %v903_v13 = vadd.f32 %v1448_v8, %v902_v12 }
 0x2d8   : > { %1469 = vtanh.f32 %v903_v13 }
 0x2dd   : > { %v905_v14 = vpop.f32.mrf.mxu2 }
 0x2de   : > { %v1470_v15 = vpop.eup %1469  ;;  %v906_v16 = vadd.f32 %v1448_v8, %v905_v14 }
 0x2df   : > { %1382 = vmatmul.msk.f32.vlgmr.msrb.gmra.mxu3 %vm534_vm1, %v1470_v15 }
 0x2e0   : > { %1471 = vtanh.f32 %v906_v16 }
 0x2e6   : > { %v1472_v17 = vpop.eup %1471 }
 0x2e7   : > { %1383 = vmatmul.msk.f32.gmra.mxu3 %vm534_vm1, %v1472_v17 }
 0x34d   : > { %v683_v22 = vpop.f32.mrf.mxu3 }
 0x34e   : > { %v684_v23 = vadd.f32 %v1449_v21, %v683_v22 }
 0x350   : > { %v689_v24 = vmax.f32 %v684_v23, 0.0 }
 0x352   : > { %1374 = vmatmul.msk.f32.vlgmr.msrb.gmra.mxu1 %vm659_vm10, %v689_v24 }
 0x355   : > { %v686_v25 = vpop.f32.mrf.mxu3 }
 0x356   : > { %v687_v26 = vadd.f32 %v1449_v21, %v686_v25 }
 0x358   : > { %v690_v27 = vmax.f32 %v687_v26, 0.0 }
 0x35a   : > { %1375 = vmatmul.msk.f32.gmra.mxu1 %vm659_vm10, %v690_v27 }
 0x362   : > { %v938_v29 = vpop.f32.mrf.mxu3 }
 0x363   : > { %v939_v30 = vadd.f32 %v1450_v28, %v938_v29 }
 0x365   : > { %v944_v31 = vsel %vm497_vm0, %v939_v30, -inf }
 0x366   : > { %945 = vmax.xlane.f32.xlu2 %v944_v31 }
 0x36a   : > { %v941_v32 = vpop.f32.mrf.mxu3 }
 0x36b   : > { %v942_v33 = vadd.f32 %v1450_v28, %v941_v32 }
 0x36d   : > { %v947_v34 = vsel %vm497_vm0, %v942_v33, -inf }
 0x36e   : > { %948 = vmax.xlane.f32.xlu2 %v947_v34 }
 0x3cf   : > { %v722_v38 = vpop.f32.mrf.mxu1 }
 0x3d0   : > { %v1854_v39 = vadd.f32 %v1451_v37, %v722_v38 }
 0x3d2   : > { %v728_v40 = vmax.f32 %v1854_v39, 0.0 }
 0x3d4   : > { %1376 = vmatmul.msk.f32.vlgmr.msrb.gmra.mxu0 %vm497_vm0, %v728_v40 }
 0x3d7   : > { %v725_v41 = vpop.f32.mrf.mxu1 }
 0x3d8   : > { %v1860_v42 = vadd.f32 %v1451_v37, %v725_v41 }
 0x3d9   : > { %v946_v43 = vpop.xlane.xlu2 %945 }
 0x3da   : > { %v729_v44 = vmax.f32 %v1860_v42, 0.0  ;;  %v950_v45 = vsub.f32 %v939_v30, %v946_v43 }
 0x3dc   : > { %v952_v46 = vmul.f32 1.442695, %v950_v45  ;;  %1377 = vmatmul.msk.f32.gmra.mxu0 %vm497_vm0, %v729_v44 }
 0x3de   : > { %1473 = vpow2.f32 %v952_v46 }
 0x3e1   : > { %v949_v47 = vpop.xlane.xlu2 %948 }
 0x3e2   : > { %v951_v48 = vsub.f32 %v942_v33, %v949_v47  ;;  %v1456_v47 = vld [vmem:[%s2073_s12] ss:$0 sm:$0xff] }
 0x3e4   : > { %v1474_v49 = vpop.eup %1473  ;;  %v954_v50 = vmul.f32 1.442695, %v951_v48 }
 0x3e5   : > { %v956_v52 = vsel %vm497_vm0, %v1474_v49, 0.0 }
 0x3e6   : > { %1475 = vpow2.f32 %v954_v50  ;;  %957 = vadd.xlane.f32.xlu0 %v956_v52 }
 0x3ec   : > { %v1476_v53 = vpop.eup %1475 }
 0x3ed   : > { %v959_v54 = vsel %vm497_vm0, %v1476_v53, 0.0 }
 0x3ee   : > { %960 = vadd.xlane.f32.xlu1 %v959_v54 }
 0x451   : > { %v759_v56 = vpop.f32.mrf.mxu0 }
 0x452   : > { %v1874_v57 = vadd.f32 %v1871_v55, %v759_v56 }
 0x454   : > { %v766_v58 = vsel %vm765_vm11, %v1874_v57, -inf  ;;  %v816_v42 = vmul.f32 1.442695, %v1874_v57 }
 0x455   : > { %767 = vmax.xlane.f32.xlu1 %v766_v58 }
 0x459   : > { %v958_v59 = vpop.xlane.xlu0 %957  ;;  %v762_v29 = vpop.f32.mrf.mxu0 }
 0x45a   : > { %1477 = vrcp.f32 %v958_v59  ;;  %v973_v3 = vand.u32 2147483648, %v958_v59  ;;  %v971_v5 = vand.u32 2147483647, %v958_v59  ;;  %vm967_vm13 = vweird.f32 %v958_v59 }
 0x45b   : > { %v1919_v56 = vadd.f32 %v1871_v55, %v762_v29 }
 0x45c   : > { %v974_v9 = vor.u32 1.1754944e-38, %v973_v3  ;;  %vm972_vm15 = vcmp.eq.f32.partialorder %v971_v5, 8.507059e+37 }
 0x460   : > { %v1478_v61 = vpop.eup %1477 }
 0x461   : > { %v963_v0 = vmul.f32 %v1478_v61, %v958_v59  ;;  %v961_v1 = vpop.xlane.xlu1 %960  ;;  %vm968_vm12 = vweird.f32 %v1478_v61 }
 0x462   : > { %1479 = vrcp.f32 %v961_v1  ;;  %vm969_vm14 = vmor %vm967_vm13, %vm968_vm12  ;;  %v988_v14 = vand.u32 2147483648, %v961_v1  ;;  %v986_v17 = vand.u32 2147483647, %v961_v1  ;;  %vm982_vm2 = vweird.f32 %v961_v1 }
 0x463   : > { %v964_v2 = vsub.f32 1.0, %v963_v0  ;;  %vm844_vm13 = vcmask 80936  }
 0x464   : > { %v989_v19 = vor.u32 1.1754944e-38, %v988_v14  ;;  %vm987_vm4 = vcmp.eq.f32.partialorder %v986_v17, 8.507059e+37 }
 0x465   : > { %v965_v4 = vmul.f32 %v1478_v61, %v964_v2 }
 0x467   : > { %v966_v6 = vadd.f32 %v1478_v61, %v965_v4 }
 0x468   : > { %v1480_v7 = vpop.eup %1479 }
 0x469   : > { %v970_v10 = vsel %vm969_vm14, %v1478_v61, %v966_v6  ;;  %v978_v8 = vmul.f32 %v1480_v7, %v961_v1  ;;  %vm983_vm1 = vweird.f32 %v1480_v7  ;;  %v769_v61 = vsel %vm765_vm11, %v1919_v56, -inf }
 0x46a   : > { %v975_v11 = vsel %vm972_vm15, %v974_v9, %v970_v10  ;;  %vm984_vm3 = vmor %vm982_vm2, %vm983_vm1  ;;  %vm847_vm14 = vcmask 121936   ;;  %vm858_vm15 = vcmask 253048  }
 0x46b   : > { %v1878_v12 = vmul.f32 %v1474_v49, %v975_v11  ;;  %v979_v13 = vsub.f32 1.0, %v978_v8 }
 0x46d   : > { %v992_v15 = vmul.f32 %v1779_v62, %v1878_v12  ;;  %v980_v16 = vmul.f32 %v1480_v7, %v979_v13 }
 0x46e   : > { %852 = vrot.lane.b32.xlu1 %v1768_v51, %s1577_s20  ;;  %v1453_v51 = vld [vmem:[%s2067_s6] ss:$0 sm:$0xff] }
 0x46f   : > { %1384 = vmatmul.msk.f32.vlgmr.msra.gmra.mxu1 %vm497_vm0, %v992_v15  ;;  %v981_v18 = vadd.f32 %v1480_v7, %v980_v16 }
 0x471   : > { %v985_v20 = vsel %vm984_vm3, %v1480_v7, %v981_v18 }
 0x472   : > { %v990_v21 = vsel %vm987_vm4, %v989_v19, %v985_v20 }
 0x473   : > { %v1885_v22 = vmul.f32 %v1476_v53, %v990_v21 }
 0x475   : > { %v993_v62 = vmul.f32 %v1784_v63, %v1885_v22  ;;  %v1454_v63 = vld [vmem:[%s2069_s8] ss:$0 sm:$0xff] }
 0x477   : > { %1385 = vmatmul.msk.f32.gmra.mxu1 %vm497_vm0, %v993_v62 }
 0x4c8   : > { %v768_v48 = vpop.xlane.xlu1 %767 }
 0x4c9   : > { %v772_v52 = vsub.f32 %v1874_v57, %v768_v48 }
 0x4cb   : > { %v774_v54 = vmul.f32 1.442695, %v772_v52 }
 0x4cd   : > { %1481 = vpow2.f32 %v774_v54 }
 0x4d3   : > { %v1927_v1 = vpop.eup %1481 }
 0x4d4   : > { %v778_v2 = vsel %vm765_vm11, %v1927_v1, 0.0 }
 0x4ec   : > { %v1023_v23 = vpop.f32.mrf.mxu1 }
 0x4ed   : > { %v1024_v24 = vadd.f32 %v1453_v51, %v1023_v23 }
 0x4ef   : > { %v1029_v25 = vmax.f32 %v1024_v24, 0.0 }
 0x4f1   : > { %1386 = vmatmul.msk.f32.vlgmr.msra.gmra.mxu0 %vm659_vm10, %v1029_v25 }
 0x4f4   : > { %v1026_v26 = vpop.f32.mrf.mxu1 }
 0x4f5   : > { %v1027_v27 = vadd.f32 %v1453_v51, %v1026_v26 }
 0x4f7   : > { %v1030_v28 = vmax.f32 %v1027_v27, 0.0 }
 0x4f9   : > { %1387 = vmatmul.msk.f32.gmra.mxu0 %vm659_vm10, %v1030_v28 }
 0x56e   : > { %v1062_v30 = vpop.f32.mrf.mxu0 }
 0x56f   : > { %v1063_v31 = vadd.f32 %v1454_v63, %v1062_v30 }
 0x571   : > { %v1068_v32 = vmax.f32 %v1063_v31, 0.0 }
 0x573   : > { %1388 = vmatmul.msk.f32.vlgmr.msra.gmra.mxu2 %vm659_vm10, %v1068_v32 }
 0x576   : > { %v1065_v33 = vpop.f32.mrf.mxu0 }
 0x577   : > { %v1066_v34 = vadd.f32 %v1454_v63, %v1065_v33 }
 0x579   : > { %v1069_v35 = vmax.f32 %v1066_v34, 0.0 }
 0x57b   : > { %1389 = vmatmul.msk.f32.gmra.mxu2 %vm659_vm10, %v1069_v35  ;;  %vm814_vm10 = vcmp.gt.f32.partialorder %v1874_v57, 20.0 }
 0x5f6   : > { %v1101_v37 = vpop.f32.mrf.mxu2 }
 0x5f7   : > { %v1102_v38 = vadd.f32 %v1455_v36, %v1101_v37 }
 0x5f9   : > { %v1107_v41 = vmax.f32 %v1102_v38, 0.0 }
 0x5fb   : > { %1390 = vmatmul.msk.f32.vlgmr.msra.gmra.mxu3 %vm497_vm0, %v1107_v41 }
 0x5fe   : > { %v1104_v43 = vpop.f32.mrf.mxu2 }
 0x5ff   : > { %v1904_v45 = vadd.f32 %v1455_v36, %v1104_v43 }
 0x601   : > { %v1108_v46 = vmax.f32 %v1904_v45, 0.0 }
 0x603   : > { %1391 = vmatmul.msk.f32.gmra.mxu3 %vm497_vm0, %v1108_v46 }
 0x67e   : > { %v1138_v49 = vpop.f32.mrf.mxu3 }
 0x67f   : > { %v1913_v50 = vadd.f32 %v1456_v47, %v1138_v49 }
 0x681   : > { %v1144_v53 = vsel %vm765_vm11, %v1913_v50, -inf  ;;  %v1194_v26 = vmul.f32 1.442695, %v1913_v50  ;;  %vm1192_vm2 = vcmp.gt.f32.partialorder %v1913_v50, 20.0 }
 0x682   : > { %1145 = vmax.xlane.f32.xlu2 %v1144_v53 }
 0x686   : > { %v1141_v58 = vpop.f32.mrf.mxu3 }
 0x687   : > { %v1921_v59 = vadd.f32 %v1456_v47, %v1141_v58 }
 0x689   : > { %v1147_v0 = vsel %vm765_vm11, %v1921_v59, -inf  ;;  %v1196_v55 = vmul.f32 1.442695, %v1921_v59  ;;  %vm1193_vm5 = vcmp.gt.f32.partialorder %v1921_v59, 20.0 }
 0x68a   : > { %770 = vmax.xlane.f32.xlu2 %v769_v61  ;;  %1148 = vmax.xlane.f32.xlu0 %v1147_v0 }
 0x68b   : > { %1483 = vpow2.f32 %v1196_v55 }
 0x691   : > { %v1484_v3 = vpop.eup %1483 }
 0x692   : > { %779 = vadd.xlane.f32.xlu2 %v778_v2  ;;  %v1207_v4 = vadd.f32 1.0, %v1484_v3  ;;  %v1210_v5 = vmul.f32 -0.5, %v1484_v3  ;;  %v1213_v9 = vand.u32 2147483647, %v1484_v3 }
 0x694   : > { %1485 = vlog2.f32 %v1207_v4  ;;  %v1211_v7 = vadd.f32 1.0, %v1210_v5  ;;  %vm1214_vm0 = vcmp.lt.f32.partialorder %v1213_v9, 0.0004427343 }
 0x695   : > { %1487 = vpow2.f32 %v816_v42 }
 0x696   : > { %v1212_v11 = vmul.f32 %v1484_v3, %v1211_v7  ;;  %v853_v3 = vpop.permute.xlu1 %852 }
 0x69a   : > { %v1486_v6 = vpop.eup %1485 }
 0x69b   : > { %v1209_v10 = vmul.f32 0.6931472, %v1486_v6  ;;  %v1488_v15 = vpop.eup %1487 }
 0x69c   : > { %v820_v21 = vadd.f32 1.0, %v1488_v15  ;;  %v823_v25 = vmul.f32 -0.5, %v1488_v15  ;;  %v826_v34 = vand.u32 2147483647, %v1488_v15 }
 0x69d   : > { %v1215_v8 = vsel %vm1214_vm0, %v1212_v11, %v1209_v10 }
 0x69e   : > { %v824_v31 = vadd.f32 1.0, %v823_v25  ;;  %vm827_vm7 = vcmp.lt.f32.partialorder %v826_v34, 0.0004427343 }
 0x6a0   : > { %v825_v37 = vmul.f32 %v1488_v15, %v824_v31 }
 0x6aa   : > { %854 = vrot.lane.b32.xlu2 %v1773_v60, %s1577_s20  ;;  %v1217_v60 = vsel %vm1193_vm5, %v1921_v59, %v1215_v8  ;;  %s1580_s20 = smov 95  }
 0x6ab   : > { %v1219_v13 = vadd.f32 0.1, %v1217_v60 }
 0x6b2   : > { %863 = vrot.lane.b32.xlu2 %v729_v44, %s1578_s15 }
 0x6ba   : > { %1233 = vrot.lane.b32.xlu2 %v1913_v50, %s1579_s24 }
 0x6c2   : > { %1246 = vrot.lane.b32.xlu2 %v1219_v13, %s1579_s24 }
 0x6ca   : > { %1264 = vrot.lane.b32.xlu2 %v1107_v41, %s1580_s20 }
 0x6f5   : > { %v1146_v44 = vpop.xlane.xlu2 %1145 }
 0x6f6   : > { %v1150_v19 = vsub.f32 %v1913_v50, %v1146_v44 }
 0x6f8   : > { %v1152_v51 = vmul.f32 1.442695, %v1150_v19 }
 0x6fd   : > { %v771_v14 = vpop.xlane.xlu2 %770  ;;  %v1149_v16 = vpop.xlane.xlu0 %1148 }
 0x6fe   : > { %v773_v17 = vsub.f32 %v1919_v56, %v771_v14  ;;  %v1151_v18 = vsub.f32 %v1921_v59, %v1149_v16 }
 0x700   : > { %v776_v20 = vmul.f32 1.442695, %v773_v17  ;;  %v1154_v62 = vmul.f32 1.442695, %v1151_v18 }
 0x702   : > { %1489 = vpow2.f32 %v776_v20 }
 0x703   : > { %1491 = vpow2.f32 %v1154_v62 }
 0x704   : > { %1493 = vlog2.f32 %v820_v21 }
 0x705   : > { %v780_v23 = vpop.xlane.xlu2 %779 }
 0x706   : > { %1495 = vrcp.f32 %v780_v23  ;;  %v795_v38 = vand.u32 2147483648, %v780_v23  ;;  %v793_v43 = vand.u32 2147483647, %v780_v23  ;;  %vm789_vm8 = vweird.f32 %v780_v23 }
 0x707   : > { %1497 = vpow2.f32 %v1152_v51 }
 0x708   : > { %v1947_v24 = vpop.eup %1489  ;;  %1499 = vpow2.f32 %v1194_v26  ;;  %v796_v53 = vor.u32 1.1754944e-38, %v795_v38  ;;  %vm794_vm12 = vcmp.eq.f32.partialorder %v793_v43, 8.507059e+37 }
 0x709   : > { %v1950_v27 = vpop.eup %1491  ;;  %v781_v28 = vsel %vm765_vm11, %v1947_v24, 0.0 }
 0x70a   : > { %v1159_v29 = vsel %vm765_vm11, %v1950_v27, 0.0  ;;  %782 = vadd.xlane.f32.xlu0 %v781_v28  ;;  %v1494_v63 = vpop.eup %1493 }
 0x70b   : > { %1160 = vadd.xlane.f32.xlu1 %v1159_v29  ;;  %v822_v35 = vmul.f32 0.6931472, %v1494_v63 }
 0x70c   : > { %v1496_v30 = vpop.eup %1495 }
 0x70d   : > { %v785_v32 = vmul.f32 %v1496_v30, %v780_v23  ;;  %v1956_v33 = vpop.eup %1497  ;;  %vm790_vm6 = vweird.f32 %v1496_v30  ;;  %v828_v49 = vsel %vm827_vm7, %v825_v37, %v822_v35  ;;  %v855_v28 = vpop.permute.xlu2 %854 }
 0x70e   : > { %v1156_v47 = vsel %vm765_vm11, %v1956_v33, 0.0  ;;  %v1500_v48 = vpop.eup %1499  ;;  %vm791_vm9 = vmor %vm789_vm8, %vm790_vm6  ;;  %v838_v61 = vsel %vm814_vm10, %v1874_v57, %v828_v49  ;;  %vm815_vm6 = vcmp.gt.f32.partialorder %v1919_v56, 20.0 }
 0x70f   : > { %v786_v36 = vsub.f32 1.0, %v785_v32  ;;  %v1198_v58 = vadd.f32 1.0, %v1500_v48  ;;  %v840_v55 = vadd.f32 0.1, %v838_v61  ;;  %v1204_v6 = vand.u32 2147483647, %v1500_v48 }
 0x711   : > { %v787_v41 = vmul.f32 %v1496_v30, %v786_v36  ;;  %1501 = vlog2.f32 %v1198_v58  ;;  %vm1205_vm1 = vcmp.lt.f32.partialorder %v1204_v6, 0.0004427343 }
 0x712   : > { %1157 = vadd.xlane.f32.xlu0 %v1156_v47 }
 0x713   : > { %v788_v52 = vadd.f32 %v1496_v30, %v787_v41 }
 0x715   : > { %v792_v54 = vsel %vm791_vm9, %v1496_v30, %v788_v52 }
 0x716   : > { %v797_v0 = vsel %vm794_vm12, %v796_v53, %v792_v54 }
 0x717   : > { %v798_v2 = vmul.f32 %v1927_v1, %v797_v0  ;;  %v1201_v1 = vmul.f32 -0.5, %v1500_v48  ;;  %v1502_v4 = vpop.eup %1501 }
 0x718   : > { %v1200_v7 = vmul.f32 0.6931472, %v1502_v4 }
 0x719   : > { %842 = vst.msk [vmem:[%s1964_s16] sm:$0xff] %vm765_vm11, %v798_v2  ;;  %v1202_v5 = vadd.f32 1.0, %v1201_v1  ;;  %v864_v2 = vpop.permute.xlu2 %863 }
 0x71a   : > { %845 = vst.msk [vmem:[%s1964_s16] sm:$0xff] %vm844_vm13, %v1874_v57 }
 0x71b   : > { %848 = vst.msk [vmem:[%s1964_s16] sm:$0xff] %vm847_vm14, %v840_v55  ;;  %v1203_v9 = vmul.f32 %v1500_v48, %v1202_v5 }
 0x71c   : > { %859 = vst.msk [vmem:[%s1964_s16] sm:$0xff] %vm858_vm15, %v853_v3 }
 0x71d   : > { %v1206_v57 = vsel %vm1205_vm1, %v1203_v9, %v1200_v7 }
 0x71e   : > { %v1216_v10 = vsel %vm1192_vm2, %v1913_v50, %v1206_v57  ;;  %vm867_vm2 = vcmask 384248  }
 0x71f   : > { %v1218_v11 = vadd.f32 0.1, %v1216_v10 }
 0x721   : > { %v1234_v5 = vpop.permute.xlu2 %1233 }
 0x724   : > { %1235 = vrot.lane.b32.xlu1 %v1921_v59, %s1579_s24  ;;  %v818_v59 = vmul.f32 1.442695, %v1919_v56 }
 0x726   : > { %861 = vrot.lane.b32.xlu0 %v728_v40, %s1578_s15  ;;  %1503 = vpow2.f32 %v818_v59 }
 0x729   : > { %v1247_v9 = vpop.permute.xlu2 %1246 }
 0x72c   : > { %1255 = vrot.lane.b32.xlu1 %v1878_v12, %s1581_s21  ;;  %v1504_v8 = vpop.eup %1503 }
 0x72d   : > { %v829_v60 = vadd.f32 1.0, %v1504_v8  ;;  %v832_v13 = vmul.f32 -0.5, %v1504_v8  ;;  %v835_v16 = vand.u32 2147483647, %v1504_v8 }
 0x72e   : > { %1244 = vrot.lane.b32.xlu0 %v1218_v11, %s1579_s24 }
 0x72f   : > { %1505 = vlog2.f32 %v829_v60  ;;  %v833_v44 = vadd.f32 1.0, %v832_v13  ;;  %vm1986_vm4 = vcmp.lt.f32.partialorder %v835_v16, 0.0004427343 }
 0x731   : > { %v834_v20 = vmul.f32 %v1504_v8, %v833_v44 }
 0x735   : > { %v1506_v42 = vpop.eup %1505 }
 0x736   : > { %v831_v18 = vmul.f32 0.6931472, %v1506_v42 }
 0x738   : > { %v837_v30 = vsel %vm1986_vm4, %v834_v20, %v831_v18 }
 0x739   : > { %v839_v41 = vsel %vm815_vm6, %v1919_v56, %v837_v30 }
 0x73a   : > { %v841_v58 = vadd.f32 0.1, %v839_v41 }
 0x77d   : > { %v783_v39 = vpop.xlane.xlu0 %782 }
 0x77e   : > { %v1161_v40 = vpop.xlane.xlu1 %1160  ;;  %1507 = vrcp.f32 %v783_v39  ;;  %v810_v62 = vand.u32 2147483648, %v783_v39  ;;  %v808_v25 = vand.u32 2147483647, %v783_v39  ;;  %vm804_vm5 = vweird.f32 %v783_v39 }
 0x77f   : > { %1509 = vrcp.f32 %v1161_v40  ;;  %v1188_v51 = vand.u32 2147483648, %v1161_v40  ;;  %v1186_v63 = vand.u32 2147483647, %v1161_v40  ;;  %vm1182_vm7 = vweird.f32 %v1161_v40 }
 0x780   : > { %v811_v34 = vor.u32 1.1754944e-38, %v810_v62  ;;  %vm809_vm9 = vcmp.eq.f32.partialorder %v808_v25, 8.507059e+37 }
 0x781   : > { %v1189_v36 = vor.u32 1.1754944e-38, %v1188_v51  ;;  %vm1187_vm12 = vcmp.eq.f32.partialorder %v1186_v63, 8.507059e+37 }
 0x784   : > { %v1508_v50 = vpop.eup %1507 }
 0x785   : > { %v1510_v14 = vpop.eup %1509  ;;  %v800_v15 = vmul.f32 %v1508_v50, %v783_v39  ;;  %v1158_v12 = vpop.xlane.xlu0 %1157  ;;  %vm805_vm3 = vweird.f32 %v1508_v50 }
 0x786   : > { %v1178_v17 = vmul.f32 %v1510_v14, %v1161_v40  ;;  %1511 = vrcp.f32 %v1158_v12  ;;  %vm1183_vm0 = vweird.f32 %v1510_v14  ;;  %vm806_vm8 = vmor %vm804_vm5, %vm805_vm3  ;;  %v1173_v53 = vand.u32 2147483648, %v1158_v12 }
 0x787   : > { %v801_v19 = vsub.f32 1.0, %v800_v15  ;;  %vm1184_vm10 = vmor %vm1182_vm7, %vm1183_vm0  ;;  %v1171_v0 = vand.u32 2147483647, %v1158_v12  ;;  %vm1167_vm3 = vweird.f32 %v1158_v12  ;;  %vm1261_vm0 = vcmask 777848  }
 0x788   : > { %v1179_v21 = vsub.f32 1.0, %v1178_v17  ;;  %vm1270_vm5 = vcmask 909048  }
 0x789   : > { %v802_v23 = vmul.f32 %v1508_v50, %v801_v19 }
 0x78a   : > { %v1180_v29 = vmul.f32 %v1510_v14, %v1179_v21 }
 0x78b   : > { %v803_v31 = vadd.f32 %v1508_v50, %v802_v23 }
 0x78c   : > { %v1512_v32 = vpop.eup %1511  ;;  %v1181_v35 = vadd.f32 %v1510_v14, %v1180_v29 }
 0x78d   : > { %v807_v37 = vsel %vm806_vm8, %v1508_v50, %v803_v31  ;;  %v1163_v38 = vmul.f32 %v1512_v32, %v1158_v12  ;;  %vm1168_vm1 = vweird.f32 %v1512_v32 }
 0x78e   : > { %v812_v43 = vsel %vm809_vm9, %v811_v34, %v807_v37  ;;  %v1185_v47 = vsel %vm1184_vm10, %v1510_v14, %v1181_v35  ;;  %vm1169_vm4 = vmor %vm1167_vm3, %vm1168_vm1 }
 0x78f   : > { %v813_v48 = vmul.f32 %v1947_v24, %v812_v43  ;;  %v1164_v49 = vsub.f32 1.0, %v1163_v38  ;;  %v1190_v52 = vsel %vm1187_vm12, %v1189_v36, %v1185_v47 }
 0x790   : > { %v1191_v54 = vmul.f32 %v1950_v27, %v1190_v52  ;;  %v1174_v27 = vor.u32 1.1754944e-38, %v1173_v53 }
 0x791   : > { %843 = vst.msk [vmem:[%s1964_s16 + $0x8] sm:$0xff] %vm765_vm11, %v813_v48  ;;  %v1165_v61 = vmul.f32 %v1512_v32, %v1164_v49  ;;  %vm1172_vm11 = vcmp.eq.f32.partialorder %v1171_v0, 8.507059e+37 }
 0x792   : > { %1224 = vrot.lane.b32.xlu0 %v1191_v54, %s1579_s24  ;;  %846 = vst.msk [vmem:[%s1964_s16 + $0x8] sm:$0xff] %vm844_vm13, %v1919_v56  ;;  %vm1228_vm13 = vcmask 564736  }
 0x793   : > { %849 = vst.msk [vmem:[%s1964_s16 + $0x8] sm:$0xff] %vm847_vm14, %v841_v58  ;;  %v1166_v24 = vadd.f32 %v1512_v32, %v1165_v61  ;;  %vm1239_vm14 = vcmask 605736  }
 0x794   : > { %860 = vst.msk [vmem:[%s1964_s16 + $0x8] sm:$0xff] %vm858_vm15, %v855_v28  ;;  %vm1250_vm15 = vcmask 646736  }
 0x795   : > { %v1170_v55 = vsel %vm1169_vm4, %v1512_v32, %v1166_v24  ;;  %869 = vst.msk [vmem:[%s1964_s16 + $0x8] sm:$0xff] %vm867_vm2, %v864_v2 }
 0x796   : > { %v1175_v3 = vsel %vm1172_vm11, %v1174_v27, %v1170_v55  ;;  %v1236_v56 = vpop.permute.xlu1 %1235 }
 0x797   : > { %v1176_v1 = vmul.f32 %v1956_v33, %v1175_v3 }
 0x798   : > { %v862_v4 = vpop.permute.xlu0 %861 }
 0x799   : > { %868 = vst.msk [vmem:[%s1964_s16] sm:$0xff] %vm867_vm2, %v862_v4  ;;  %1222 = vrot.lane.b32.xlu1 %v1176_v1, %s1579_s24 }
 0x79a   : > { %1257 = vrot.lane.b32.xlu0 %v1885_v22, %s1581_s21 }
 0x79e   : > { %v1256_v33 = vpop.permute.xlu1 %1255 }
 0x7a0   : > { %v1245_v6 = vpop.permute.xlu0 %1244 }
 0x7a1   : > { %1266 = vrot.lane.b32.xlu1 %v1108_v46, %s1580_s20  ;;  %s1285_s20 = scalar_lea.hbm %s2074_s13, %s1398_s22  ;;  %v1265_v46 = vpop.permute.xlu2 %1264 }
 0x7a2   : > { %s1288_s21 = sshll.u32 %s1285_s20, 4  ;;  %s1289_s21 = int_to_ptr.hbm [resolvable:$true] %s1288_s21 }
 0x7a3   : > { %s1527_s15 = sshra.s32 %s1289_s21, 4  ;;  %s1528_s15 = int_to_ptr.hbm [resolvable:$true] %s1527_s15 }
 0x7a4   : > { %s1529_s22 = scalar_lea.hbm %s1528_s15, 16  ;;  %p1534_p2 = scmp.lt.s32.totalorder %s1528_s15, %s2074_s13 }
 0x7a5   : > { %p1530_p13 = scmp.ne.s32.totalorder %s1528_s15, %s1529_s22  ;;  %p1535_p3 = scmp.lt.s32.totalorder %s1533_s1, %s1529_s22 }
 0x7a7   : > { %p1531_p0 = pnand %p1530_p13, %p1692_p6  ;;  %p1536_p4 = por %p1535_p3, %p1534_p2 }
 0x7a9   : > { %p1532_p1 = pneg %p1531_p0 }
 0x7ab   : > { %p1537_p5 = pnand %p1536_p4, %p1532_p1 }
 0x804   : > { %v1225_v7 = vpop.permute.xlu0 %1224 }
 0x805   : > { %1230 = vst.msk [vmem:[%s1964_s16 + $0x8] sm:$0xff] %vm1228_vm13, %v1225_v7 }
 0x806   : > { %1241 = vst.msk [vmem:[%s1964_s16 + $0x8] sm:$0xff] %vm1239_vm14, %v1236_v56 }
 0x807   : > { %1252 = vst.msk [vmem:[%s1964_s16 + $0x8] sm:$0xff] %vm1250_vm15, %v1247_v9 }
 0x80b   : > { %v1223_v22 = vpop.permute.xlu1 %1222 }
 0x80c   : > { %1229 = vst.msk [vmem:[%s1964_s16] sm:$0xff] %vm1228_vm13, %v1223_v22  ;;  %v1258_v45 = vpop.permute.xlu0 %1257 }
 0x80d   : > { %1240 = vst.msk [vmem:[%s1964_s16] sm:$0xff] %vm1239_vm14, %v1234_v5 }
 0x80e   : > { %1251 = vst.msk [vmem:[%s1964_s16] sm:$0xff] %vm1250_vm15, %v1245_v6 }
 0x80f   : > { %1262 = vst.msk [vmem:[%s1964_s16] sm:$0xff] %vm1261_vm0, %v1256_v33 }
 0x810   : > { %1263 = vst.msk [vmem:[%s1964_s16 + $0x8] sm:$0xff] %vm1261_vm0, %v1258_v45 }
 0x811   : > { %1271 = vst.msk [vmem:[%s1964_s16] sm:$0xff] %vm1270_vm5, %v1265_v46 }
 0x813   : > { %v1267_v57 = vpop.permute.xlu1 %1266 }
 0x814   : > { %1272 = vst.msk [vmem:[%s1964_s16 + $0x8] sm:$0xff] %vm1270_vm5, %v1267_v57 }
 0x815   : > { %1540 = shalt.err (!%p1537_p5)
}
 0x816   : > { %s1582_s23 = smov 128   ;;  %s1583_s16 = smov 8  }
 0x817   : > { %1399 = dma.vmem_to_hbm [thread:$0]  (%p1692_p6), %s1287_s30, 256, %s1289_s21, %s1274_s29, %s1582_s23, %s1582_s23, %s1583_s16  }
 0x818 PF: > { %s1303_s3 = sand.u32 1, %s1563_s25   ;;  %p1402_p7 = pnand %p1359_p9, %p1696_p8 }
 0x819   : > { %s1304_s0 = scalar_lea.sflag [#allocation4], %s1303_s3 }
 0x81a   : > { %p1403_p10 = pneg %p1402_p7 }
 0x81c   : > { %1558 = dma.done.wait (%p1403_p10), %s1304_s0, 256  }
 0x81d   : > { %1560 = vsyncadd (%p1403_p10), %s1304_s0, 4294967040  ;;  %p23_p11 = scmp.ge.s32.totalorder %s1677_s14, 4   ;;  %s2087_s25 = smov %s1567_s26 }
 0x81e   : > { %s2088_s26 = smov %s1571_s27  ;;  %s2089_s27 = smov %s1690_s17 }
 0x81f   : > { %s2090_s28 = smov %s1677_s14  ;;  %25 = sbr.rel (!%p23_p11) target bundleno = 8 (0x8), region = 151 }
 0x824   :  { %1310 = vsyncpa [#allocation4], 1 }
 0x825   :  { %1312 = vsyncpa [#allocation4 + $0x1], 1 }

</bundles_post_ra>
